<compile_context>
chip_gen: v5e
topology: v5e:2x2
jax: 0.10.0
libtpu: 0.0.40
codegen_flags: <defaults>
</compile_context>

<pallas_src>
import functools
import jax
import jax.numpy as jnp
from jax import lax
from jax.experimental import pallas as pl
from jax.experimental.pallas import tpu as pltpu


# ----------------------------------------------------------------------------
# tiling helpers
# ----------------------------------------------------------------------------
def _pick_tile(size, n_parallel=1, min_steps=2, cap=2048):
    """Largest lane tile (multiple of 128, <= cap) dividing `size`, preferring a
    tile that gives at least `min_steps` total grid steps; falls back to full."""
    cands = [c for c in (2048, 1024, 512, 256, 128) if c <= cap and size % c == 0]
    if not cands:
        return size
    for t in cands:
        if n_parallel * (size // t) >= min_steps:
            return t
    return cands[-1]


def _attn_tile(hw, n_parallel, vmem_budget=8 << 20):
    # keep the live (HW, t) f32 score/exp temporaries within a VMEM budget
    # (v7x has only 64 MiB physical / 32 MiB scoped VMEM).
    cap = max(128, (vmem_budget // max(hw * 8, 1)) // 128 * 128)
    return _pick_tile(hw, n_parallel, min_steps=4, cap=min(cap, 2048))


def _round8(n):
    return -(-n // 8) * 8


# ----------------------------------------------------------------------------
# Pallas kernel 1: fused multi-branch 1x1 conv + bias + PReLU  (bf16 outputs)
# ----------------------------------------------------------------------------
def _fused1x1_kernel(x_ref, w_ref, b_ref, s_ref, *o_refs, couts, pads):
    # x: (1, Cin, T) f32 | w: (Ctot, Cin) f32 | b,s: (Ctot, 1) f32
    # o_i: (1, Cout_i, T) out_dtype.  Branch rows are padded to multiples of 8
    # so every output slice of `y` starts on a sublane-aligned offset.
    x = x_ref[0].astype(jnp.bfloat16)
    w = w_ref[...].astype(jnp.bfloat16)
    acc = jnp.dot(w, x, preferred_element_type=jnp.float32)      # (Ctot, T)
    acc = acc + b_ref[...]
    y = jnp.where(acc >= 0, acc, s_ref[...] * acc)
    off = 0
    for o_ref, c, cp in zip(o_refs, couts, pads):
        o_ref[0] = y[off:off + c, :].astype(o_ref.dtype)
        off += cp


def fused_conv1x1_prelu(x, branches, out_dtype=jnp.bfloat16):
    """One Pallas matmul for several 1x1-conv + PReLU branches on the same x.

    x: (N, Cin, H, W) f32.  Returns a tuple of (N, Cout_i, H*W) `out_dtype`
    arrays (one per branch), each lane-dense (spatial last)."""
    N, Cin, H, W = x.shape
    S = H * W
    couts = [int(p['w'].shape[0]) for p in branches]
    pads = [_round8(c) for c in couts]
    Ctot = sum(pads)

    w_parts, b_parts, s_parts = [], [], []
    for p, c, cp in zip(branches, couts, pads):
        w_parts.append(jnp.pad(p['w'].reshape(c, Cin), ((0, cp - c), (0, 0))))
        b_parts.append(jnp.pad(p['b'].astype(jnp.float32), (0, cp - c)))
        s_parts.append(jnp.pad(jnp.full((c,), p['slope'], jnp.float32),
                               (0, cp - c)))
    w_all = jnp.concatenate(w_parts, axis=0).astype(jnp.float32)
    b_all = jnp.concatenate(b_parts, axis=0).reshape(Ctot, 1)
    s_all = jnp.concatenate(s_parts, axis=0).reshape(Ctot, 1)

    cols = x.reshape(N, Cin, S)
    t = _pick_tile(S, N, min_steps=2, cap=2048)
    grid = (N, S // t)
    kern = functools.partial(_fused1x1_kernel, couts=tuple(couts),
                             pads=tuple(pads))
    out_bytes = sum(N * c * S * jnp.dtype(out_dtype).itemsize for c in couts)
    cost = pl.CostEstimate(
        flops=2 * N * Ctot * Cin * S + 3 * N * Ctot * S,
        transcendentals=0,
        bytes_accessed=N * Cin * S * 4 + Ctot * (Cin + 2) * 4 + out_bytes)
    return pl.pallas_call(
        kern,
        out_shape=tuple(jax.ShapeDtypeStruct((N, c, S), out_dtype) for c in couts),
        grid=grid,
        in_specs=[pl.BlockSpec((1, Cin, t), lambda n, s: (n, 0, s)),
                  pl.BlockSpec((Ctot, Cin), lambda n, s: (0, 0)),
                  pl.BlockSpec((Ctot, 1), lambda n, s: (0, 0)),
                  pl.BlockSpec((Ctot, 1), lambda n, s: (0, 0))],
        out_specs=tuple(pl.BlockSpec((1, c, t), lambda n, s: (n, 0, s))
                        for c in couts),
        compiler_params=pltpu.CompilerParams(
            dimension_semantics=("parallel", "parallel")),
        cost_estimate=cost,
    )(cols, w_all, b_all, s_all)


# ----------------------------------------------------------------------------
# Pallas kernel 2: non-local attention (scores -> softmax -> weighted sum)
# ----------------------------------------------------------------------------
def _nla_kernel(k_ref, v_ref, q_ref, o_ref):
    # k: (1, Ce, HW), v: (1, C, HW), q: (1, Ce, T) bf16 | o: (1, C, T) f32
    # Transposed-LHS dot: contract over Ce without materializing (HW, Ce).
    s = lax.dot_general(k_ref[0], q_ref[0], (((0,), (0,)), ((), ())),
                        preferred_element_type=jnp.float32)        # (HW, T)
    s = s - jnp.max(s, axis=0, keepdims=True)
    e = jnp.exp(s)
    p = e * pl.reciprocal(jnp.sum(e, axis=0, keepdims=True), approx=True)
    o_ref[0] = jnp.dot(v_ref[0], p.astype(jnp.bfloat16),
                       preferred_element_type=jnp.float32)


def pallas_nonlocal(keys, vals, queries):
    """keys/queries: (N, Ce, HW), vals: (N, C, HW) bf16 -> (N, C, HW) f32."""
    N, Ce, HW = keys.shape
    C = vals.shape[1]
    t = _attn_tile(HW, N)
    cost = pl.CostEstimate(
        flops=2 * N * HW * HW * (Ce + C) + 5 * N * HW * HW,
        transcendentals=N * HW * HW,
        bytes_accessed=(keys.size + vals.size + queries.size) * 2
                       + N * C * HW * 4)
    return pl.pallas_call(
        _nla_kernel,
        out_shape=jax.ShapeDtypeStruct((N, C, HW), jnp.float32),
        grid=(N, HW // t),
        in_specs=[pl.BlockSpec((1, Ce, HW), lambda n, s: (n, 0, 0)),
                  pl.BlockSpec((1, C, HW), lambda n, s: (n, 0, 0)),
                  pl.BlockSpec((1, Ce, t), lambda n, s: (n, 0, s))],
        out_specs=pl.BlockSpec((1, C, t), lambda n, s: (n, 0, s)),
        compiler_params=pltpu.CompilerParams(
            dimension_semantics=("parallel", "parallel"),
            vmem_limit_bytes=32 * 1024 * 1024),
        cost_estimate=cost,
    )(keys, vals, queries)


# ----------------------------------------------------------------------------
# Pallas kernel 3: cross-scale attention (norm + scale folded in)
# ----------------------------------------------------------------------------
def _csa_kernel(w_ref, x_ref, raw_ref, o_ref, *, softmax_scale):
    # w: (1, CKe, L), x: (1, CKe, T), raw: (1, CKK, L) bf16 | o: (1, CKK, T) f32
    wf = w_ref[0].astype(jnp.float32)
    norm = jnp.sqrt(jnp.sum(wf * wf, axis=0, keepdims=True))        # (1, L)
    # fold per-patch L2 normalization AND softmax_scale into the key columns
    # (broadcast along sublanes -> no transpose of the (1, L) vector needed)
    w_s = (wf * (softmax_scale / jnp.maximum(norm, 1e-4))).astype(jnp.bfloat16)
    s = lax.dot_general(w_s, x_ref[0], (((0,), (0,)), ((), ())),
                        preferred_element_type=jnp.float32)         # (L, T)
    s = s - jnp.max(s, axis=0, keepdims=True)
    e = jnp.exp(s)
    p = e * pl.reciprocal(jnp.sum(e, axis=0, keepdims=True), approx=True)
    o_ref[0] = jnp.dot(raw_ref[0], p.astype(jnp.bfloat16),
                       preferred_element_type=jnp.float32)


def pallas_cross_scale(wpat, xpat, raw_t, softmax_scale):
    """wpat: (N, CKe, L), xpat: (N, CKe, HW), raw_t: (N, CKK, L) bf16
       -> (N, CKK, HW) f32."""
    N, CKe, L = wpat.shape
    HW = xpat.shape[2]
    CKK = raw_t.shape[1]
    t = _attn_tile(HW, N)
    kern = functools.partial(_csa_kernel, softmax_scale=softmax_scale)
    cost = pl.CostEstimate(
        flops=2 * N * HW * L * (CKe + CKK) + 5 * N * L * HW,
        transcendentals=N * L * HW,
        bytes_accessed=(wpat.size + xpat.size + raw_t.size) * 2
                       + N * CKK * HW * 4)
    return pl.pallas_call(
        kern,
        out_shape=jax.ShapeDtypeStruct((N, CKK, HW), jnp.float32),
        grid=(N, HW // t),
        in_specs=[pl.BlockSpec((1, CKe, L), lambda n, s: (n, 0, 0)),
                  pl.BlockSpec((1, CKe, t), lambda n, s: (n, 0, s)),
                  pl.BlockSpec((1, CKK, L), lambda n, s: (n, 0, 0))],
        out_specs=pl.BlockSpec((1, CKK, t), lambda n, s: (n, 0, s)),
        compiler_params=pltpu.CompilerParams(
            dimension_semantics=("parallel", "parallel"),
            vmem_limit_bytes=32 * 1024 * 1024),
        cost_estimate=cost,
    )(wpat, xpat, raw_t)


# ----------------------------------------------------------------------------
# XLA glue: patch extraction / fold (single conv ops, pure data movement)
# ----------------------------------------------------------------------------
def same_pads(H, W, k, stride):
    oH = -(-H // stride)
    oW = -(-W // stride)
    ph = max(0, (oH - 1) * stride + k - H)
    pw = max(0, (oW - 1) * stride + k - W)
    return (ph // 2, ph - ph // 2, pw // 2, pw - pw // 2)


def extract_patches(x, k, stride, pads):
    """(N,C,H,W) -> (N, C*k*k, oH, oW); channel order (c, kh, kw), c major."""
    pt, pb, pl_, pr = pads
    return lax.conv_general_dilated_patches(
        x, (k, k), (stride, stride), [(pt, pb), (pl_, pr)],
        dimension_numbers=('NCHW', 'OIHW', 'NCHW'))


def col2im_fold(cols_img, C, k, stride, pad):
    """Overlap-add fold of (N, C*k*k, H, W) patches (order (c,kh,kw)) via an
    identity-kernel transposed conv."""
    eye = jnp.eye(k * k, dtype=cols_img.dtype).reshape(k * k, k, k)
    eye_flip = eye[:, ::-1, ::-1]
    rhs = jnp.broadcast_to(eye_flip[None], (C, k * k, k, k))
    return lax.conv_general_dilated(
        cols_img, rhs, window_strides=(1, 1),
        padding=[(k - 1 - pad, k - 1 - pad)] * 2,
        lhs_dilation=(stride, stride),
        dimension_numbers=('NCHW', 'OIHW', 'NCHW'),
        feature_group_count=C)


# ----------------------------------------------------------------------------
# k x k (de)convolutions: XLA native conv + fused bias/PReLU epilogue
# (avoids im2col's k^2 HBM blow-up and any standalone elementwise kernel)
# ----------------------------------------------------------------------------
def conv2d_block(x, p, stride, pad, act=True):
    w, b = p['w'], p['b']
    y = lax.conv_general_dilated(
        x, w, (stride, stride), [(pad, pad), (pad, pad)],
        dimension_numbers=('NCHW', 'OIHW', 'NCHW'))
    y = y + b.reshape(1, -1, 1, 1)
    if act:
        y = jnp.where(y >= 0, y, p['slope'] * y)
    return y


def conv_transpose_block(x, p, stride, pad):
    w, b, slope = p['w'], p['b'], p['slope']            # w: (Cin, Cout, k, k)
    k = w.shape[2]
    rhs = jnp.transpose(w, (1, 0, 2, 3))[:, :, ::-1, ::-1]
    y = lax.conv_general_dilated(
        x, rhs, window_strides=(1, 1),
        padding=[(k - 1 - pad, k - 1 - pad)] * 2,
        lhs_dilation=(stride, stride),
        dimension_numbers=('NCHW', 'OIHW', 'NCHW'))
    y = y + b.reshape(1, -1, 1, 1)
    return jnp.where(y >= 0, y, slope * y)


# ----------------------------------------------------------------------------
# Attention modules
# ----------------------------------------------------------------------------
def nonlocal_attention(p, x):
    N, C, H, W = x.shape
    # one fused matmul: queries (m1), keys (m2), values (asm) -> bf16
    q, k, v = fused_conv1x1_prelu(x, [p['m1'], p['m2'], p['asm']])
    out = pallas_nonlocal(k, v, q)                       # (N, C, HW) f32
    return out.reshape(N, C, H, W)


def bilinear_half(x):
    # F.interpolate(scale_factor=0.5, bilinear, align_corners=False) for an
    # exact /2 downscale equals 2x2 average pooling.
    N, C, H, W = x.shape
    return x.reshape(N, C, H // 2, 2, W // 2, 2).mean(axis=(3, 5))


def cross_scale_attention(p, x, scale=2, ksize=3, stride=1, softmax_scale=10.0):
    N, C, H, W = x.shape
    Ce = p['m1']['w'].shape[0]
    HW = H * W
    # queries (m1) + values (asm) in one fused bf16 matmul
    match_cols, embed_cols = fused_conv1x1_prelu(x, [p['m1'], p['asm']])
    match_x = match_cols.reshape(N, Ce, H, W)
    embed_w = embed_cols.reshape(N, C, H, W)

    x_half = bilinear_half(x)
    Hs, Ws = x_half.shape[2], x_half.shape[3]
    (ref_cols,) = fused_conv1x1_prelu(x_half, [p['m2']])
    ref = ref_cols.reshape(N, Ce, Hs, Ws)

    kernel = scale * ksize
    big_stride = scale * stride

    raw = extract_patches(embed_w, kernel, big_stride,
                          same_pads(H, W, kernel, big_stride))      # values
    _, CKK, rH, rW = raw.shape
    L = rH * rW
    raw_t = raw.reshape(N, CKK, L)

    wpat = extract_patches(ref, ksize, stride,
                           same_pads(Hs, Ws, ksize, stride))        # keys
    CKe = wpat.shape[1]
    wpat = wpat.reshape(N, CKe, L)

    xpat = extract_patches(match_x, ksize, 1, same_pads(H, W, ksize, 1))
    xpat = xpat.reshape(N, CKe, HW)                                 # queries

    cols = pallas_cross_scale(wpat, xpat, raw_t, softmax_scale)     # f32
    out = col2im_fold(cols.reshape(N, CKK, H, W), C, kernel, big_stride, scale)
    # TODO(synk): the /6.0 overlap normalization is hard-coded for
    # scale=2, ksize=3, stride=1, exactly as in the reference CSNLN code.
    return out / 6.0


# ----------------------------------------------------------------------------
# CSNLN modules
# ----------------------------------------------------------------------------
def resblock(p0, p1, x):
    y = conv2d_block(x, p0, 1, 1)
    y = conv2d_block(y, p1, 1, 1, act=False)
    return y + x                                   # res_scale = 1


def multi_source_projection(p, x):
    down = nonlocal_attention(p['nla'], x)
    down_map = conv_transpose_block(down, p['up'], stride=2, pad=2)  # 6/2/2
    up_map = cross_scale_attention(p['csa'], x, scale=2)
    err = resblock(p['enc0'], p['enc1'], up_map - down_map)
    return down_map + err


def recurrent_projection(p, x):
    x_up = multi_source_projection(p['msp'], x)
    x_down = conv2d_block(x_up, p['ds1'], 2, 2)                      # 6/2/2
    error_up = conv_transpose_block(x - x_down, p['ee'], stride=2, pad=2)
    h_estimate = x_up + error_up
    x_final = conv2d_block(conv2d_block(h_estimate, p['ds2'], 2, 2),
                           p['post'], 1, 1)
    return x_final, h_estimate


RGB_MEAN = jnp.array([0.4488, 0.4371, 0.404], jnp.float32)


def csnln_forward(params, x, depth=2, rgb_range=1.0):
    mean = (rgb_range * RGB_MEAN).reshape(1, 3, 1, 1)
    x = x - mean                                       # sub_mean (std = 1)
    x = conv2d_block(x, params['head0'], 1, 1)
    x = conv2d_block(x, params['head1'], 1, 1)
    bag = []
    for _ in range(depth):
        x, h = recurrent_projection(params['sem'], x)
        bag.append(h)
    h_feature = jnp.concatenate(bag, axis=1)
    h_final = conv2d_block(h_feature, params['tail'], 1, 1, act=False)
    return h_final + mean                              # add_mean


# ----------------------------------------------------------------------------
# Deterministic parameter init (synthetic; no checkpoint)
# ----------------------------------------------------------------------------
def init_params(key, n_colors=3, n_feats=8, depth=2):
    keys = iter(jax.random.split(key, 64))

    def conv_p(cin, cout, k, with_act=True):
        p = {'w': 0.1 * jax.random.normal(next(keys), (cout, cin, k, k), jnp.float32),
             'b': jnp.zeros((cout,), jnp.float32)}
        if with_act:
            p['slope'] = jnp.float32(0.25)             # nn.PReLU() default init
        return p

    def deconv_p(cin, cout, k):
        return {'w': 0.1 * jax.random.normal(next(keys), (cin, cout, k, k), jnp.float32),
                'b': jnp.zeros((cout,), jnp.float32),
                'slope': jnp.float32(0.25)}

    F, Fe = n_feats, n_feats // 2
    return {
        'head0': conv_p(n_colors, F, 3),
        'head1': conv_p(F, F, 3),
        'sem': {
            'msp': {
                'csa': {'m1': conv_p(F, Fe, 1), 'm2': conv_p(F, Fe, 1),
                        'asm': conv_p(F, F, 1)},
                'nla': {'m1': conv_p(F, Fe, 1), 'm2': conv_p(F, Fe, 1),
                        'asm': conv_p(F, F, 1)},
                'up': deconv_p(F, F, 6),
                'enc0': conv_p(F, F, 3),
                'enc1': conv_p(F, F, 3, with_act=False),
            },
            'ds1': conv_p(F, F, 6),
            'ds2': conv_p(F, F, 6),
            'ee': deconv_p(F, F, 6),
            'post': conv_p(F, F, 3),
        },
        'tail': conv_p(F * depth, n_colors, 3, with_act=False),
    }


if __name__ == "__main__":
    N, n_colors, n_feats, depth = 2, 3, 8, 2
    H = W = 16                                  # LR input; SR output is 2H x 2W
    key = jax.random.PRNGKey(0)
    k_in, k_par = jax.random.split(key)
    x = jax.random.uniform(k_in, (N, n_colors, H, W), jnp.float32)
    params = init_params(k_par, n_colors=n_colors, n_feats=n_feats, depth=depth)

    fwd = jax.jit(functools.partial(csnln_forward, depth=depth, rgb_range=1.0))
    out = jax.block_until_ready(fwd(params, x))
    assert out.shape == (N, n_colors, 2 * H, 2 * W), out.shape
    assert bool(jnp.all(jnp.isfinite(out)))
    print("KERNEL_OK")
</pallas_src>

<mosaic_0001>
module attributes {stable_mosaic.version = 11 : i64} {
  func.func @_fused1x1_kernel(%arg0: i32, %arg1: i32, %arg2: memref<1x8x256xf32, #tpu.memory_space<vmem>>, %arg3: memref<16x8xf32, #tpu.memory_space<vmem>>, %arg4: memref<16x1xf32, #tpu.memory_space<vmem>>, %arg5: memref<16x1xf32, #tpu.memory_space<vmem>>, %arg6: memref<1x4x256xbf16, #tpu.memory_space<vmem>>, %arg7: memref<1x8x256xbf16, #tpu.memory_space<vmem>>) attributes {dimension_semantics = [#tpu.dimension_semantics<parallel>, #tpu.dimension_semantics<parallel>], iteration_bounds = array<i64: 2, 1>, scalar_prefetch = 0 : i64, scratch_operands = 0 : i64, tpu.core_type = #tpu.core_type<tc>, window_params = [{transform_indices = @transform_0, window_bounds = array<i64: 1, 8, 256>}, {pipeline_mode = #tpu.pipeline_mode<synchronous>, transform_indices = @transform_1, window_bounds = array<i64: 16, 8>}, {pipeline_mode = #tpu.pipeline_mode<synchronous>, transform_indices = @transform_2, window_bounds = array<i64: 16, 1>}, {pipeline_mode = #tpu.pipeline_mode<synchronous>, transform_indices = @transform_3, window_bounds = array<i64: 16, 1>}, {transform_indices = @transform_4, window_bounds = array<i64: 1, 4, 256>}, {transform_indices = @transform_5, window_bounds = array<i64: 1, 8, 256>}]} {
    %c0 = arith.constant 0 : index
    %c0_0 = arith.constant 0 : index
    %c0_1 = arith.constant 0 : index
    %0 = vector.load %arg2[%c0, %c0_0, %c0_1] : memref<1x8x256xf32, #tpu.memory_space<vmem>>, vector<1x8x256xf32>
    %1 = vector.shape_cast %0 : vector<1x8x256xf32> to vector<8x256xf32>
    %2 = arith.truncf %1 : vector<8x256xf32> to vector<8x256xbf16>
    %c0_2 = arith.constant 0 : index
    %c0_3 = arith.constant 0 : index
    %3 = vector.load %arg3[%c0_2, %c0_3] : memref<16x8xf32, #tpu.memory_space<vmem>>, vector<16x8xf32>
    %4 = arith.truncf %3 : vector<16x8xf32> to vector<16x8xbf16>
    %cst = arith.constant dense<0.000000e+00> : vector<16x256xf32>
    %5 = tpu.matmul %4, %2, %cst {dimension_numbers = #tpu.dot_dimension_numbers<[1], [0], [0], [1], [0, 0, 1, 1], [], []>} : vector<16x8xbf16>, vector<8x256xbf16>, vector<16x256xf32> -> vector<16x256xf32>
    %c0_4 = arith.constant 0 : index
    %c0_5 = arith.constant 0 : index
    %6 = vector.load %arg4[%c0_4, %c0_5] : memref<16x1xf32, #tpu.memory_space<vmem>>, vector<16x1xf32>
    %7 = vector.broadcast %6 : vector<16x1xf32> to vector<16x256xf32>
    %8 = arith.addf %5, %7 : vector<16x256xf32>
    %cst_6 = arith.constant 0.000000e+00 : f32
    %9 = vector.broadcast %cst_6 : f32 to vector<16x256xf32>
    %10 = arith.cmpf oge, %8, %9 : vector<16x256xf32>
    %c0_7 = arith.constant 0 : index
    %c0_8 = arith.constant 0 : index
    %11 = vector.load %arg5[%c0_7, %c0_8] : memref<16x1xf32, #tpu.memory_space<vmem>>, vector<16x1xf32>
    %12 = vector.broadcast %11 : vector<16x1xf32> to vector<16x256xf32>
    %13 = arith.mulf %12, %8 : vector<16x256xf32>
    %14 = arith.select %10, %8, %13 : vector<16x256xi1>, vector<16x256xf32>
    %15 = vector.extract_strided_slice %14 {offsets = [0, 0], sizes = [4, 256], strides = [1, 1]} : vector<16x256xf32> to vector<4x256xf32>
    %16 = arith.truncf %15 : vector<4x256xf32> to vector<4x256xbf16>
    %c0_9 = arith.constant 0 : index
    %c0_10 = arith.constant 0 : index
    %c0_11 = arith.constant 0 : index
    %17 = vector.load %arg6[%c0_9, %c0_10, %c0_11] : memref<1x4x256xbf16, #tpu.memory_space<vmem>>, vector<1x4x256xbf16>
    %18 = vector.shape_cast %17 : vector<1x4x256xbf16> to vector<4x256xbf16>
    %19 = vector.shape_cast %16 : vector<4x256xbf16> to vector<1x4x256xbf16>
    tpu.vector_store %arg6[%c0_9, %c0_10, %c0_11], %19 {strides = array<i32>} : memref<1x4x256xbf16, #tpu.memory_space<vmem>>, vector<1x4x256xbf16>,
    %20 = vector.extract_strided_slice %14 {offsets = [8, 0], sizes = [8, 256], strides = [1, 1]} : vector<16x256xf32> to vector<8x256xf32>
    %21 = arith.truncf %20 : vector<8x256xf32> to vector<8x256xbf16>
    %c0_12 = arith.constant 0 : index
    %c0_13 = arith.constant 0 : index
    %c0_14 = arith.constant 0 : index
    %22 = vector.load %arg7[%c0_12, %c0_13, %c0_14] : memref<1x8x256xbf16, #tpu.memory_space<vmem>>, vector<1x8x256xbf16>
    %23 = vector.shape_cast %22 : vector<1x8x256xbf16> to vector<8x256xbf16>
    %24 = vector.shape_cast %21 : vector<8x256xbf16> to vector<1x8x256xbf16>
    tpu.vector_store %arg7[%c0_12, %c0_13, %c0_14], %24 {strides = array<i32>} : memref<1x8x256xbf16, #tpu.memory_space<vmem>>, vector<1x8x256xbf16>,
    return
  }
  func.func @transform_0(%arg0: i32, %arg1: i32) -> (i32, i32, i32) {
    %c0_i32 = arith.constant 0 : i32
    %c0_i32_0 = arith.constant 0 : i32
    return %arg0, %c0_i32, %arg1 : i32, i32, i32
  }
  func.func @transform_1(%arg0: i32, %arg1: i32) -> (i32, i32) {
    %c0_i32 = arith.constant 0 : i32
    %c0_i32_0 = arith.constant 0 : i32
    %c0_i32_1 = arith.constant 0 : i32
    return %c0_i32, %c0_i32_0 : i32, i32
  }
  func.func @transform_2(%arg0: i32, %arg1: i32) -> (i32, i32) {
    %c0_i32 = arith.constant 0 : i32
    %c0_i32_0 = arith.constant 0 : i32
    %c0_i32_1 = arith.constant 0 : i32
    return %c0_i32, %c0_i32_0 : i32, i32
  }
  func.func @transform_3(%arg0: i32, %arg1: i32) -> (i32, i32) {
    %c0_i32 = arith.constant 0 : i32
    %c0_i32_0 = arith.constant 0 : i32
    %c0_i32_1 = arith.constant 0 : i32
    return %c0_i32, %c0_i32_0 : i32, i32
  }
  func.func @transform_4(%arg0: i32, %arg1: i32) -> (i32, i32, i32) {
    %c0_i32 = arith.constant 0 : i32
    %c0_i32_0 = arith.constant 0 : i32
    return %arg0, %c0_i32, %arg1 : i32, i32, i32
  }
  func.func @transform_5(%arg0: i32, %arg1: i32) -> (i32, i32, i32) {
    %c0_i32 = arith.constant 0 : i32
    %c0_i32_0 = arith.constant 0 : i32
    return %arg0, %c0_i32, %arg1 : i32, i32, i32
  }
}

module attributes {stable_mosaic.version = 11 : i64} {
  func.func @_fused1x1_kernel(%arg0: i32, %arg1: i32, %arg2: memref<1x8x64xf32, #tpu.memory_space<vmem>>, %arg3: memref<8x8xf32, #tpu.memory_space<vmem>>, %arg4: memref<8x1xf32, #tpu.memory_space<vmem>>, %arg5: memref<8x1xf32, #tpu.memory_space<vmem>>, %arg6: memref<1x4x64xbf16, #tpu.memory_space<vmem>>) attributes {dimension_semantics = [#tpu.dimension_semantics<parallel>, #tpu.dimension_semantics<parallel>], iteration_bounds = array<i64: 2, 1>, scalar_prefetch = 0 : i64, scratch_operands = 0 : i64, tpu.core_type = #tpu.core_type<tc>, window_params = [{transform_indices = @transform_0, window_bounds = array<i64: 1, 8, 64>}, {pipeline_mode = #tpu.pipeline_mode<synchronous>, transform_indices = @transform_1, window_bounds = array<i64: 8, 8>}, {pipeline_mode = #tpu.pipeline_mode<synchronous>, transform_indices = @transform_2, window_bounds = array<i64: 8, 1>}, {pipeline_mode = #tpu.pipeline_mode<synchronous>, transform_indices = @transform_3, window_bounds = array<i64: 8, 1>}, {transform_indices = @transform_4, window_bounds = array<i64: 1, 4, 64>}]} {
    %c0 = arith.constant 0 : index
    %c0_0 = arith.constant 0 : index
    %c0_1 = arith.constant 0 : index
    %0 = vector.load %arg2[%c0, %c0_0, %c0_1] : memref<1x8x64xf32, #tpu.memory_space<vmem>>, vector<1x8x64xf32>
    %1 = vector.shape_cast %0 : vector<1x8x64xf32> to vector<8x64xf32>
    %2 = arith.truncf %1 : vector<8x64xf32> to vector<8x64xbf16>
    %c0_2 = arith.constant 0 : index
    %c0_3 = arith.constant 0 : index
    %3 = vector.load %arg3[%c0_2, %c0_3] : memref<8x8xf32, #tpu.memory_space<vmem>>, vector<8x8xf32>
    %4 = arith.truncf %3 : vector<8x8xf32> to vector<8x8xbf16>
    %cst = arith.constant dense<0.000000e+00> : vector<8x64xf32>
    %5 = tpu.matmul %4, %2, %cst {dimension_numbers = #tpu.dot_dimension_numbers<[1], [0], [0], [1], [0, 0, 1, 1], [], []>} : vector<8x8xbf16>, vector<8x64xbf16>, vector<8x64xf32> -> vector<8x64xf32>
    %c0_4 = arith.constant 0 : index
    %c0_5 = arith.constant 0 : index
    %6 = vector.load %arg4[%c0_4, %c0_5] : memref<8x1xf32, #tpu.memory_space<vmem>>, vector<8x1xf32>
    %7 = vector.broadcast %6 : vector<8x1xf32> to vector<8x64xf32>
    %8 = arith.addf %5, %7 : vector<8x64xf32>
    %cst_6 = arith.constant 0.000000e+00 : f32
    %9 = vector.broadcast %cst_6 : f32 to vector<8x64xf32>
    %10 = arith.cmpf oge, %8, %9 : vector<8x64xf32>
    %c0_7 = arith.constant 0 : index
    %c0_8 = arith.constant 0 : index
    %11 = vector.load %arg5[%c0_7, %c0_8] : memref<8x1xf32, #tpu.memory_space<vmem>>, vector<8x1xf32>
    %12 = vector.broadcast %11 : vector<8x1xf32> to vector<8x64xf32>
    %13 = arith.mulf %12, %8 : vector<8x64xf32>
    %14 = arith.select %10, %8, %13 : vector<8x64xi1>, vector<8x64xf32>
    %15 = vector.extract_strided_slice %14 {offsets = [0, 0], sizes = [4, 64], strides = [1, 1]} : vector<8x64xf32> to vector<4x64xf32>
    %16 = arith.truncf %15 : vector<4x64xf32> to vector<4x64xbf16>
    %c0_9 = arith.constant 0 : index
    %c0_10 = arith.constant 0 : index
    %c0_11 = arith.constant 0 : index
    %17 = vector.load %arg6[%c0_9, %c0_10, %c0_11] : memref<1x4x64xbf16, #tpu.memory_space<vmem>>, vector<1x4x64xbf16>
    %18 = vector.shape_cast %17 : vector<1x4x64xbf16> to vector<4x64xbf16>
    %19 = vector.shape_cast %16 : vector<4x64xbf16> to vector<1x4x64xbf16>
    tpu.vector_store %arg6[%c0_9, %c0_10, %c0_11], %19 {strides = array<i32>} : memref<1x4x64xbf16, #tpu.memory_space<vmem>>, vector<1x4x64xbf16>,
    return
  }
  func.func @transform_0(%arg0: i32, %arg1: i32) -> (i32, i32, i32) {
    %c0_i32 = arith.constant 0 : i32
    %c0_i32_0 = arith.constant 0 : i32
    return %arg0, %c0_i32, %arg1 : i32, i32, i32
  }
  func.func @transform_1(%arg0: i32, %arg1: i32) -> (i32, i32) {
    %c0_i32 = arith.constant 0 : i32
    %c0_i32_0 = arith.constant 0 : i32
    %c0_i32_1 = arith.constant 0 : i32
    return %c0_i32, %c0_i32_0 : i32, i32
  }
  func.func @transform_2(%arg0: i32, %arg1: i32) -> (i32, i32) {
    %c0_i32 = arith.constant 0 : i32
    %c0_i32_0 = arith.constant 0 : i32
    %c0_i32_1 = arith.constant 0 : i32
    return %c0_i32, %c0_i32_0 : i32, i32
  }
  func.func @transform_3(%arg0: i32, %arg1: i32) -> (i32, i32) {
    %c0_i32 = arith.constant 0 : i32
    %c0_i32_0 = arith.constant 0 : i32
    %c0_i32_1 = arith.constant 0 : i32
    return %c0_i32, %c0_i32_0 : i32, i32
  }
  func.func @transform_4(%arg0: i32, %arg1: i32) -> (i32, i32, i32) {
    %c0_i32 = arith.constant 0 : i32
    %c0_i32_0 = arith.constant 0 : i32
    return %arg0, %c0_i32, %arg1 : i32, i32, i32
  }
}

module attributes {stable_mosaic.version = 11 : i64} {
  func.func @_csa_kernel(%arg0: i32, %arg1: i32, %arg2: memref<1x36x64xbf16, #tpu.memory_space<vmem>>, %arg3: memref<1x36x128xbf16, #tpu.memory_space<vmem>>, %arg4: memref<1x288x64xbf16, #tpu.memory_space<vmem>>, %arg5: memref<1x288x128xf32, #tpu.memory_space<vmem>>) attributes {dimension_semantics = [#tpu.dimension_semantics<parallel>, #tpu.dimension_semantics<parallel>], iteration_bounds = array<i64: 2, 2>, scalar_prefetch = 0 : i64, scratch_operands = 0 : i64, tpu.core_type = #tpu.core_type<tc>, window_params = [{transform_indices = @transform_0, window_bounds = array<i64: 1, 36, 64>}, {transform_indices = @transform_1, window_bounds = array<i64: 1, 36, 128>}, {transform_indices = @transform_2, window_bounds = array<i64: 1, 288, 64>}, {transform_indices = @transform_3, window_bounds = array<i64: 1, 288, 128>}]} {
    %c0 = arith.constant 0 : index
    %c0_0 = arith.constant 0 : index
    %c0_1 = arith.constant 0 : index
    %0 = vector.load %arg2[%c0, %c0_0, %c0_1] : memref<1x36x64xbf16, #tpu.memory_space<vmem>>, vector<1x36x64xbf16>
    %1 = vector.shape_cast %0 : vector<1x36x64xbf16> to vector<36x64xbf16>
    %2 = arith.extf %1 : vector<36x64xbf16> to vector<36x64xf32>
    %3 = arith.mulf %2, %2 : vector<36x64xf32>
    %cst = arith.constant dense<0.000000e+00> : vector<64xf32>
    %4 = vector.multi_reduction <add>, %3, %cst [0] : vector<36x64xf32> to vector<64xf32>
    %5 = vector.shape_cast %4 : vector<64xf32> to vector<1x64xf32>
    %6 = math.sqrt %5 : vector<1x64xf32>
    %cst_2 = arith.constant 9.99999974E-5 : f32
    %7 = vector.broadcast %cst_2 : f32 to vector<1x64xf32>
    %8 = arith.maximumf %6, %7 : vector<1x64xf32>
    %cst_3 = arith.constant 1.000000e+01 : f32
    %9 = vector.broadcast %cst_3 : f32 to vector<1x64xf32>
    %10 = arith.divf %9, %8 : vector<1x64xf32>
    %11 = vector.broadcast %10 : vector<1x64xf32> to vector<36x64xf32>
    %12 = arith.mulf %2, %11 : vector<36x64xf32>
    %13 = arith.truncf %12 : vector<36x64xf32> to vector<36x64xbf16>
    %c0_4 = arith.constant 0 : index
    %c0_5 = arith.constant 0 : index
    %c0_6 = arith.constant 0 : index
    %14 = vector.load %arg3[%c0_4, %c0_5, %c0_6] : memref<1x36x128xbf16, #tpu.memory_space<vmem>>, vector<1x36x128xbf16>
    %15 = vector.shape_cast %14 : vector<1x36x128xbf16> to vector<36x128xbf16>
    %cst_7 = arith.constant dense<0.000000e+00> : vector<64x128xf32>
    %16 = tpu.matmul %13, %15, %cst_7 {dimension_numbers = #tpu.dot_dimension_numbers<[0], [0], [1], [1], [0, 1, 1, 1], [], []>} : vector<36x64xbf16>, vector<36x128xbf16>, vector<64x128xf32> -> vector<64x128xf32>
    %cst_8 = arith.constant dense<0xFF800000> : vector<128xf32>
    %17 = vector.multi_reduction <maximumf>, %16, %cst_8 [0] : vector<64x128xf32> to vector<128xf32>
    %18 = vector.shape_cast %17 : vector<128xf32> to vector<1x128xf32>
    %19 = vector.broadcast %18 : vector<1x128xf32> to vector<64x128xf32>
    %20 = arith.subf %16, %19 : vector<64x128xf32>
    %21 = math.exp %20 : vector<64x128xf32>
    %cst_9 = arith.constant dense<0.000000e+00> : vector<128xf32>
    %22 = vector.multi_reduction <add>, %21, %cst_9 [0] : vector<64x128xf32> to vector<128xf32>
    %23 = vector.shape_cast %22 : vector<128xf32> to vector<1x128xf32>
    %24 = tpu.reciprocal %23 {approx = true} : vector<1x128xf32> -> vector<1x128xf32>
    %25 = vector.broadcast %24 : vector<1x128xf32> to vector<64x128xf32>
    %26 = arith.mulf %21, %25 : vector<64x128xf32>
    %c0_10 = arith.constant 0 : index
    %c0_11 = arith.constant 0 : index
    %c0_12 = arith.constant 0 : index
    %27 = vector.load %arg4[%c0_10, %c0_11, %c0_12] : memref<1x288x64xbf16, #tpu.memory_space<vmem>>, vector<1x288x64xbf16>
    %28 = vector.shape_cast %27 : vector<1x288x64xbf16> to vector<288x64xbf16>
    %29 = arith.truncf %26 : vector<64x128xf32> to vector<64x128xbf16>
    %cst_13 = arith.constant dense<0.000000e+00> : vector<288x128xf32>
    %30 = tpu.matmul %28, %29, %cst_13 {dimension_numbers = #tpu.dot_dimension_numbers<[1], [0], [0], [1], [0, 0, 1, 1], [], []>} : vector<288x64xbf16>, vector<64x128xbf16>, vector<288x128xf32> -> vector<288x128xf32>
    %c0_14 = arith.constant 0 : index
    %c0_15 = arith.constant 0 : index
    %c0_16 = arith.constant 0 : index
    %31 = vector.load %arg5[%c0_14, %c0_15, %c0_16] : memref<1x288x128xf32, #tpu.memory_space<vmem>>, vector<1x288x128xf32>
    %32 = vector.shape_cast %31 : vector<1x288x128xf32> to vector<288x128xf32>
    %33 = vector.shape_cast %30 : vector<288x128xf32> to vector<1x288x128xf32>
    tpu.vector_store %arg5[%c0_14, %c0_15, %c0_16], %33 {strides = array<i32>} : memref<1x288x128xf32, #tpu.memory_space<vmem>>, vector<1x288x128xf32>,
    return
  }
  func.func @transform_0(%arg0: i32, %arg1: i32) -> (i32, i32, i32) {
    %c0_i32 = arith.constant 0 : i32
    %c0_i32_0 = arith.constant 0 : i32
    %c0_i32_1 = arith.constant 0 : i32
    return %arg0, %c0_i32, %c0_i32_0 : i32, i32, i32
  }
  func.func @transform_1(%arg0: i32, %arg1: i32) -> (i32, i32, i32) {
    %c0_i32 = arith.constant 0 : i32
    %c0_i32_0 = arith.constant 0 : i32
    return %arg0, %c0_i32, %arg1 : i32, i32, i32
  }
  func.func @transform_2(%arg0: i32, %arg1: i32) -> (i32, i32, i32) {
    %c0_i32 = arith.constant 0 : i32
    %c0_i32_0 = arith.constant 0 : i32
    %c0_i32_1 = arith.constant 0 : i32
    return %arg0, %c0_i32, %c0_i32_0 : i32, i32, i32
  }
  func.func @transform_3(%arg0: i32, %arg1: i32) -> (i32, i32, i32) {
    %c0_i32 = arith.constant 0 : i32
    %c0_i32_0 = arith.constant 0 : i32
    return %arg0, %c0_i32, %arg1 : i32, i32, i32
  }
}

module attributes {stable_mosaic.version = 11 : i64} {
  func.func @_fused1x1_kernel(%arg0: i32, %arg1: i32, %arg2: memref<1x8x256xf32, #tpu.memory_space<vmem>>, %arg3: memref<24x8xf32, #tpu.memory_space<vmem>>, %arg4: memref<24x1xf32, #tpu.memory_space<vmem>>, %arg5: memref<24x1xf32, #tpu.memory_space<vmem>>, %arg6: memref<1x4x256xbf16, #tpu.memory_space<vmem>>, %arg7: memref<1x4x256xbf16, #tpu.memory_space<vmem>>, %arg8: memref<1x8x256xbf16, #tpu.memory_space<vmem>>) attributes {dimension_semantics = [#tpu.dimension_semantics<parallel>, #tpu.dimension_semantics<parallel>], iteration_bounds = array<i64: 2, 1>, scalar_prefetch = 0 : i64, scratch_operands = 0 : i64, tpu.core_type = #tpu.core_type<tc>, window_params = [{transform_indices = @transform_0, window_bounds = array<i64: 1, 8, 256>}, {pipeline_mode = #tpu.pipeline_mode<synchronous>, transform_indices = @transform_1, window_bounds = array<i64: 24, 8>}, {pipeline_mode = #tpu.pipeline_mode<synchronous>, transform_indices = @transform_2, window_bounds = array<i64: 24, 1>}, {pipeline_mode = #tpu.pipeline_mode<synchronous>, transform_indices = @transform_3, window_bounds = array<i64: 24, 1>}, {transform_indices = @transform_4, window_bounds = array<i64: 1, 4, 256>}, {transform_indices = @transform_5, window_bounds = array<i64: 1, 4, 256>}, {transform_indices = @transform_6, window_bounds = array<i64: 1, 8, 256>}]} {
    %c0 = arith.constant 0 : index
    %c0_0 = arith.constant 0 : index
    %c0_1 = arith.constant 0 : index
    %0 = vector.load %arg2[%c0, %c0_0, %c0_1] : memref<1x8x256xf32, #tpu.memory_space<vmem>>, vector<1x8x256xf32>
    %1 = vector.shape_cast %0 : vector<1x8x256xf32> to vector<8x256xf32>
    %2 = arith.truncf %1 : vector<8x256xf32> to vector<8x256xbf16>
    %c0_2 = arith.constant 0 : index
    %c0_3 = arith.constant 0 : index
    %3 = vector.load %arg3[%c0_2, %c0_3] : memref<24x8xf32, #tpu.memory_space<vmem>>, vector<24x8xf32>
    %4 = arith.truncf %3 : vector<24x8xf32> to vector<24x8xbf16>
    %cst = arith.constant dense<0.000000e+00> : vector<24x256xf32>
    %5 = tpu.matmul %4, %2, %cst {dimension_numbers = #tpu.dot_dimension_numbers<[1], [0], [0], [1], [0, 0, 1, 1], [], []>} : vector<24x8xbf16>, vector<8x256xbf16>, vector<24x256xf32> -> vector<24x256xf32>
    %c0_4 = arith.constant 0 : index
    %c0_5 = arith.constant 0 : index
    %6 = vector.load %arg4[%c0_4, %c0_5] : memref<24x1xf32, #tpu.memory_space<vmem>>, vector<24x1xf32>
    %7 = vector.broadcast %6 : vector<24x1xf32> to vector<24x256xf32>
    %8 = arith.addf %5, %7 : vector<24x256xf32>
    %cst_6 = arith.constant 0.000000e+00 : f32
    %9 = vector.broadcast %cst_6 : f32 to vector<24x256xf32>
    %10 = arith.cmpf oge, %8, %9 : vector<24x256xf32>
    %c0_7 = arith.constant 0 : index
    %c0_8 = arith.constant 0 : index
    %11 = vector.load %arg5[%c0_7, %c0_8] : memref<24x1xf32, #tpu.memory_space<vmem>>, vector<24x1xf32>
    %12 = vector.broadcast %11 : vector<24x1xf32> to vector<24x256xf32>
    %13 = arith.mulf %12, %8 : vector<24x256xf32>
    %14 = arith.select %10, %8, %13 : vector<24x256xi1>, vector<24x256xf32>
    %15 = vector.extract_strided_slice %14 {offsets = [0, 0], sizes = [4, 256], strides = [1, 1]} : vector<24x256xf32> to vector<4x256xf32>
    %16 = arith.truncf %15 : vector<4x256xf32> to vector<4x256xbf16>
    %c0_9 = arith.constant 0 : index
    %c0_10 = arith.constant 0 : index
    %c0_11 = arith.constant 0 : index
    %17 = vector.load %arg6[%c0_9, %c0_10, %c0_11] : memref<1x4x256xbf16, #tpu.memory_space<vmem>>, vector<1x4x256xbf16>
    %18 = vector.shape_cast %17 : vector<1x4x256xbf16> to vector<4x256xbf16>
    %19 = vector.shape_cast %16 : vector<4x256xbf16> to vector<1x4x256xbf16>
    tpu.vector_store %arg6[%c0_9, %c0_10, %c0_11], %19 {strides = array<i32>} : memref<1x4x256xbf16, #tpu.memory_space<vmem>>, vector<1x4x256xbf16>,
    %20 = vector.extract_strided_slice %14 {offsets = [8, 0], sizes = [4, 256], strides = [1, 1]} : vector<24x256xf32> to vector<4x256xf32>
    %21 = arith.truncf %20 : vector<4x256xf32> to vector<4x256xbf16>
    %c0_12 = arith.constant 0 : index
    %c0_13 = arith.constant 0 : index
    %c0_14 = arith.constant 0 : index
    %22 = vector.load %arg7[%c0_12, %c0_13, %c0_14] : memref<1x4x256xbf16, #tpu.memory_space<vmem>>, vector<1x4x256xbf16>
    %23 = vector.shape_cast %22 : vector<1x4x256xbf16> to vector<4x256xbf16>
    %24 = vector.shape_cast %21 : vector<4x256xbf16> to vector<1x4x256xbf16>
    tpu.vector_store %arg7[%c0_12, %c0_13, %c0_14], %24 {strides = array<i32>} : memref<1x4x256xbf16, #tpu.memory_space<vmem>>, vector<1x4x256xbf16>,
    %25 = vector.extract_strided_slice %14 {offsets = [16, 0], sizes = [8, 256], strides = [1, 1]} : vector<24x256xf32> to vector<8x256xf32>
    %26 = arith.truncf %25 : vector<8x256xf32> to vector<8x256xbf16>
    %c0_15 = arith.constant 0 : index
    %c0_16 = arith.constant 0 : index
    %c0_17 = arith.constant 0 : index
    %27 = vector.load %arg8[%c0_15, %c0_16, %c0_17] : memref<1x8x256xbf16, #tpu.memory_space<vmem>>, vector<1x8x256xbf16>
    %28 = vector.shape_cast %27 : vector<1x8x256xbf16> to vector<8x256xbf16>
    %29 = vector.shape_cast %26 : vector<8x256xbf16> to vector<1x8x256xbf16>
    tpu.vector_store %arg8[%c0_15, %c0_16, %c0_17], %29 {strides = array<i32>} : memref<1x8x256xbf16, #tpu.memory_space<vmem>>, vector<1x8x256xbf16>,
    return
  }
  func.func @transform_0(%arg0: i32, %arg1: i32) -> (i32, i32, i32) {
    %c0_i32 = arith.constant 0 : i32
    %c0_i32_0 = arith.constant 0 : i32
    return %arg0, %c0_i32, %arg1 : i32, i32, i32
  }
  func.func @transform_1(%arg0: i32, %arg1: i32) -> (i32, i32) {
    %c0_i32 = arith.constant 0 : i32
    %c0_i32_0 = arith.constant 0 : i32
    %c0_i32_1 = arith.constant 0 : i32
    return %c0_i32, %c0_i32_0 : i32, i32
  }
  func.func @transform_2(%arg0: i32, %arg1: i32) -> (i32, i32) {
    %c0_i32 = arith.constant 0 : i32
    %c0_i32_0 = arith.constant 0 : i32
    %c0_i32_1 = arith.constant 0 : i32
    return %c0_i32, %c0_i32_0 : i32, i32
  }
  func.func @transform_3(%arg0: i32, %arg1: i32) -> (i32, i32) {
    %c0_i32 = arith.constant 0 : i32
    %c0_i32_0 = arith.constant 0 : i32
    %c0_i32_1 = arith.constant 0 : i32
    return %c0_i32, %c0_i32_0 : i32, i32
  }
  func.func @transform_4(%arg0: i32, %arg1: i32) -> (i32, i32, i32) {
    %c0_i32 = arith.constant 0 : i32
    %c0_i32_0 = arith.constant 0 : i32
    return %arg0, %c0_i32, %arg1 : i32, i32, i32
  }
  func.func @transform_5(%arg0: i32, %arg1: i32) -> (i32, i32, i32) {
    %c0_i32 = arith.constant 0 : i32
    %c0_i32_0 = arith.constant 0 : i32
    return %arg0, %c0_i32, %arg1 : i32, i32, i32
  }
  func.func @transform_6(%arg0: i32, %arg1: i32) -> (i32, i32, i32) {
    %c0_i32 = arith.constant 0 : i32
    %c0_i32_0 = arith.constant 0 : i32
    return %arg0, %c0_i32, %arg1 : i32, i32, i32
  }
}

module attributes {stable_mosaic.version = 11 : i64} {
  func.func @_nla_kernel(%arg0: i32, %arg1: i32, %arg2: memref<1x4x256xbf16, #tpu.memory_space<vmem>>, %arg3: memref<1x8x256xbf16, #tpu.memory_space<vmem>>, %arg4: memref<1x4x128xbf16, #tpu.memory_space<vmem>>, %arg5: memref<1x8x128xf32, #tpu.memory_space<vmem>>) attributes {dimension_semantics = [#tpu.dimension_semantics<parallel>, #tpu.dimension_semantics<parallel>], iteration_bounds = array<i64: 2, 2>, scalar_prefetch = 0 : i64, scratch_operands = 0 : i64, tpu.core_type = #tpu.core_type<tc>, window_params = [{transform_indices = @transform_0, window_bounds = array<i64: 1, 4, 256>}, {transform_indices = @transform_1, window_bounds = array<i64: 1, 8, 256>}, {transform_indices = @transform_2, window_bounds = array<i64: 1, 4, 128>}, {transform_indices = @transform_3, window_bounds = array<i64: 1, 8, 128>}]} {
    %c0 = arith.constant 0 : index
    %c0_0 = arith.constant 0 : index
    %c0_1 = arith.constant 0 : index
    %0 = vector.load %arg2[%c0, %c0_0, %c0_1] : memref<1x4x256xbf16, #tpu.memory_space<vmem>>, vector<1x4x256xbf16>
    %1 = vector.shape_cast %0 : vector<1x4x256xbf16> to vector<4x256xbf16>
    %c0_2 = arith.constant 0 : index
    %c0_3 = arith.constant 0 : index
    %c0_4 = arith.constant 0 : index
    %2 = vector.load %arg4[%c0_2, %c0_3, %c0_4] : memref<1x4x128xbf16, #tpu.memory_space<vmem>>, vector<1x4x128xbf16>
    %3 = vector.shape_cast %2 : vector<1x4x128xbf16> to vector<4x128xbf16>
    %cst = arith.constant dense<0.000000e+00> : vector<256x128xf32>
    %4 = tpu.matmul %1, %3, %cst {dimension_numbers = #tpu.dot_dimension_numbers<[0], [0], [1], [1], [0, 1, 1, 1], [], []>} : vector<4x256xbf16>, vector<4x128xbf16>, vector<256x128xf32> -> vector<256x128xf32>
    %cst_5 = arith.constant dense<0xFF800000> : vector<128xf32>
    %5 = vector.multi_reduction <maximumf>, %4, %cst_5 [0] : vector<256x128xf32> to vector<128xf32>
    %6 = vector.shape_cast %5 : vector<128xf32> to vector<1x128xf32>
    %7 = vector.broadcast %6 : vector<1x128xf32> to vector<256x128xf32>
    %8 = arith.subf %4, %7 : vector<256x128xf32>
    %9 = math.exp %8 : vector<256x128xf32>
    %cst_6 = arith.constant dense<0.000000e+00> : vector<128xf32>
    %10 = vector.multi_reduction <add>, %9, %cst_6 [0] : vector<256x128xf32> to vector<128xf32>
    %11 = vector.shape_cast %10 : vector<128xf32> to vector<1x128xf32>
    %12 = tpu.reciprocal %11 {approx = true} : vector<1x128xf32> -> vector<1x128xf32>
    %13 = vector.broadcast %12 : vector<1x128xf32> to vector<256x128xf32>
    %14 = arith.mulf %9, %13 : vector<256x128xf32>
    %c0_7 = arith.constant 0 : index
    %c0_8 = arith.constant 0 : index
    %c0_9 = arith.constant 0 : index
    %15 = vector.load %arg3[%c0_7, %c0_8, %c0_9] : memref<1x8x256xbf16, #tpu.memory_space<vmem>>, vector<1x8x256xbf16>
    %16 = vector.shape_cast %15 : vector<1x8x256xbf16> to vector<8x256xbf16>
    %17 = arith.truncf %14 : vector<256x128xf32> to vector<256x128xbf16>
    %cst_10 = arith.constant dense<0.000000e+00> : vector<8x128xf32>
    %18 = tpu.matmul %16, %17, %cst_10 {dimension_numbers = #tpu.dot_dimension_numbers<[1], [0], [0], [1], [0, 0, 1, 1], [], []>} : vector<8x256xbf16>, vector<256x128xbf16>, vector<8x128xf32> -> vector<8x128xf32>
    %c0_11 = arith.constant 0 : index
    %c0_12 = arith.constant 0 : index
    %c0_13 = arith.constant 0 : index
    %19 = vector.load %arg5[%c0_11, %c0_12, %c0_13] : memref<1x8x128xf32, #tpu.memory_space<vmem>>, vector<1x8x128xf32>
    %20 = vector.shape_cast %19 : vector<1x8x128xf32> to vector<8x128xf32>
    %21 = vector.shape_cast %18 : vector<8x128xf32> to vector<1x8x128xf32>
    tpu.vector_store %arg5[%c0_11, %c0_12, %c0_13], %21 {strides = array<i32>} : memref<1x8x128xf32, #tpu.memory_space<vmem>>, vector<1x8x128xf32>,
    return
  }
  func.func @transform_0(%arg0: i32, %arg1: i32) -> (i32, i32, i32) {
    %c0_i32 = arith.constant 0 : i32
    %c0_i32_0 = arith.constant 0 : i32
    %c0_i32_1 = arith.constant 0 : i32
    return %arg0, %c0_i32, %c0_i32_0 : i32, i32, i32
  }
  func.func @transform_1(%arg0: i32, %arg1: i32) -> (i32, i32, i32) {
    %c0_i32 = arith.constant 0 : i32
    %c0_i32_0 = arith.constant 0 : i32
    %c0_i32_1 = arith.constant 0 : i32
    return %arg0, %c0_i32, %c0_i32_0 : i32, i32, i32
  }
  func.func @transform_2(%arg0: i32, %arg1: i32) -> (i32, i32, i32) {
    %c0_i32 = arith.constant 0 : i32
    %c0_i32_0 = arith.constant 0 : i32
    return %arg0, %c0_i32, %arg1 : i32, i32, i32
  }
  func.func @transform_3(%arg0: i32, %arg1: i32) -> (i32, i32, i32) {
    %c0_i32 = arith.constant 0 : i32
    %c0_i32_0 = arith.constant 0 : i32
    return %arg0, %c0_i32, %arg1 : i32, i32, i32
  }
}

</mosaic_0001>

<bundles_post_ra>
// kernel: csnln_forward.12
= control target key start
LH: loop header
LB: loop body
LE: loop exit
PB: predicated region body
PF: predicated region fallthrough
CT: control target
= control target key end

     0   :  { %s619_s18 = smov 0   ;;  %s621_s19 = smov 0   ;;  %s678_s0 = inlined_call_operand.vmem [shape: f32[2,8,256], index: 0, kind: input, shape index: {}]   ;;  %s679_s1 = inlined_call_operand.vmem [shape: f32[16,8], index: 1, kind: input, shape index: {}]   ;;  %s680_s2 = inlined_call_operand.vmem [shape: f32[16,1], index: 2, kind: input, shape index: {}]   ;;  %s681_s3 = inlined_call_operand.vmem [shape: f32[16,1], index: 3, kind: input, shape index: {}]   ;;  %s682_s4 = inlined_call_operand.vmem [shape: bf16[2,4,256], index: 4, kind: output, shape index: {0}]   ;;  %s683_s5 = inlined_call_operand.vmem [shape: bf16[2,8,256], index: 5, kind: output, shape index: {1}]  }
   0x1   :  { %s623_s20 = smov 0  }
   0x2 LB: > { %s28_s21 = sadd.s32 1, %s582_s19  ;;  %p523_p0 = scmp.ge.s32.totalorder %s586_s20, 1  ;;  %s586_s20 = sphi %s623_s20, %s16_s20   ;;  %s582_s19 = sphi %s621_s19, %s685_s19   ;;  %s578_s18 = sphi %s619_s18, %s684_s18  }
   0x3   : > { %p30_p1 = scmp.ge.s32.totalorder %s28_s21, 2  ;;  %p213_p2 = scmp.lt.s32.totalorder %s586_s20, 3 }
   0x5   : > { %s687_s21 = smov (%p30_p1, %s28_s21), 0  ;;  %p214_p3 = pnand %p523_p0, %p213_p2 }
   0x6   : > { %p259_p4 = scmp.lt.s32.totalorder (!%p214_p3), %s578_s18, 1 }
   0x7   : > { %217 = sbr.rel (%p214_p3) target bundleno = 165 (0xa5), region = 36 }
   0xc   : > { %v588_v0 = vmov 0   ;;  %v296_v1 = vld [vmem:[%s680_s2] sm:$0xff]  ;;  %v297_v2 = vld [vmem:[%s680_s2 + $0x8] sm:$0xff]  ;;  %s689_s18 = smov (!%p259_p4, %s578_s18), 1  ;;  %vm312_vm0 = vcmask 1043456   ;;  %vm308_vm1 = vcmask 64512  }
   0xd   : > { %562 = vset.pattern.permute.xlu0 %v588_v0  ;;  %563 = vset.pattern.permute.xlu1 %v588_v0  ;;  %s534_s26 = sshll.u32 %s689_s18, 4  ;;  %v293_v3 = vld [vmem:[%s679_s1] sm:$0xff]  ;;  %v294_v6 = vld [vmem:[%s679_s1 + $0x8] sm:$0xff]  ;;  %s535_s13 = sshll.u32 %s689_s18, 2  ;;  %vm374_vm4 = vcmask 1041408  }
   0xe   : > { %300 = vperm.xlu0 %562, %v296_v1   ;;  %305 = vperm.xlu1 %563, %v297_v2   ;;  %s266_s29 = scalar_lea.vmem %s678_s0, %s534_s26  ;;  %v351_v9 = vld [vmem:[%s681_s3] sm:$0xff]  ;;  %v352_v10 = vld [vmem:[%s681_s3 + $0x8] sm:$0xff]  ;;  %v295_v13 = vpack.c.bf16 %v294_v6, %v293_v3  ;;  %s276_s16 = scalar_lea.vmem %s682_s4, %s535_s13 }
   0xf   : > { %v289_v4 = vld [vmem:[%s266_s29] sm:$0xff]  ;;  %v290_v5 = vld [vmem:[%s266_s29 + $0x8] sm:$0xff]  ;;  %s536_s17 = sshll.u32 %s689_s18, 3 }
  0x10   : > { %v291_v7 = vpack.c.bf16 %v289_v4, %v289_v4  ;;  %v292_v8 = vpack.c.bf16 %v290_v5, %v290_v5  ;;  %s286_s24 = scalar_lea.vmem %s683_s5, %s536_s17 }
  0x12   : > { %v314_v11 = vsel %vm312_vm0, %v291_v7, 0  ;;  %v317_v12 = vsel %vm312_vm0, %v292_v8, 0 }
  0x13   : > { %326 = vmatpush.bf16.msra.mxu0 %v314_v11  ;;  %340 = vmatpush.bf16.msra.mxu1 %v317_v12 }
  0x16   : > { %355 = vperm.xlu0 %562, %v351_v9   ;;  %360 = vperm.xlu1 %563, %v352_v10  }
  0x17   : > { %530 = vmatmul.msk.bf16.vlgmr.msra.gmra.mxu0 %vm308_vm1, %v295_v13  ;;  %531 = vmatmul.msk.bf16.vlgmr.msra.gmra.mxu1 %vm308_vm1, %v295_v13 }
  0x80   : > { %v301_v14 = vpop.permute.xlu0 %300  ;;  %v306_v15 = vpop.permute.xlu1 %305 }
  0x88   : > { %v356_v20 = vpop.permute.xlu0 %355  ;;  %v361_v32 = vpop.permute.xlu1 %360 }
  0x94   : > { %v328_v16 = vpop.f32.mrf.mxu0  ;;  %v342_v17 = vpop.f32.mrf.mxu1 }
  0x95   : > { %v329_v18 = vadd.f32 %v328_v16, %v301_v14  ;;  %v343_v19 = vadd.f32 %v342_v17, %v301_v14 }
  0x97   : > { %vm347_vm2 = vcmp.ge.f32.partialorder %v329_v18, 0.0  ;;  %v363_v21 = vmul.f32 %v356_v20, %v329_v18  ;;  %vm348_vm3 = vcmp.ge.f32.partialorder %v343_v19, 0.0  ;;  %v364_v22 = vmul.f32 %v356_v20, %v343_v19 }
  0x99   : > { %v367_v23 = vsel %vm347_vm2, %v329_v18, %v363_v21  ;;  %v368_v24 = vsel %vm348_vm3, %v343_v19, %v364_v22 }
  0x9a   : > { %v371_v25 = vpack.c.bf16 %v368_v24, %v367_v23 }
  0x9c   : > { %v373_v26 = vrot.slane %v371_v25, 2  ;;  %v330_v27 = vpop.f32.mrf.mxu0  ;;  %v344_v28 = vpop.f32.mrf.mxu1 }
  0x9d   : > { %v331_v29 = vadd.f32 %v330_v27, %v306_v15  ;;  %v345_v30 = vadd.f32 %v344_v28, %v306_v15 }
  0x9e   : > { %v377_v31 = vsel %vm374_vm4, %v371_v25, %v373_v26 }
  0x9f   : > { %379 = vst [vmem:[%s276_s16] sm:$0xf] %v377_v31  ;;  %vm349_vm5 = vcmp.ge.f32.partialorder %v331_v29, 0.0  ;;  %v365_v33 = vmul.f32 %v361_v32, %v331_v29  ;;  %vm350_vm6 = vcmp.ge.f32.partialorder %v345_v30, 0.0  ;;  %v366_v34 = vmul.f32 %v361_v32, %v345_v30 }
  0xa1   : > { %v369_v35 = vsel %vm349_vm5, %v331_v29, %v365_v33  ;;  %v370_v36 = vsel %vm350_vm6, %v345_v30, %v366_v34 }
  0xa2   : > { %v380_v37 = vpack.c.bf16 %v370_v36, %v369_v35 }
  0xa4   : > { %381 = vst [vmem:[%s286_s24] sm:$0xff] %v380_v37 }
  0xa5 PF: > { %s16_s20 = sadd.s32 1, %s586_s20   ;;  %s684_s18 = smov %s582_s19 }
  0xa6   : > { %p13_p5 = scmp.ge.s32.totalorder %s16_s20, 4   ;;  %s685_s19 = smov %s687_s21 }
  0xa8   :  { %15 = sbr.rel (!%p13_p5) target bundleno = 2 (0x2), region = 78 }

// kernel: csnln_forward.13
= control target key start
LH: loop header
LB: loop body
LE: loop exit
PB: predicated region body
PF: predicated region fallthrough
CT: control target
= control target key end

     0   :  { %s428_s15 = smov 0   ;;  %s430_s16 = smov 0   ;;  %s470_s0 = inlined_call_operand.vmem [shape: f32[2,8,64], index: 0, kind: input, shape index: {}]   ;;  %s471_s1 = inlined_call_operand.vmem [shape: f32[8,8], index: 1, kind: input, shape index: {}]   ;;  %s472_s2 = inlined_call_operand.vmem [shape: f32[8,1], index: 2, kind: input, shape index: {}]   ;;  %s473_s3 = inlined_call_operand.vmem [shape: f32[8,1], index: 3, kind: input, shape index: {}]   ;;  %s474_s4 = inlined_call_operand.vmem [shape: bf16[2,4,64], index: 4, kind: output, shape index: {}]  }
   0x1   :  { %s432_s17 = smov 0  }
   0x2 LB: > { %s26_s18 = sadd.s32 1, %s396_s16  ;;  %p346_p0 = scmp.ge.s32.totalorder %s400_s17, 1  ;;  %s400_s17 = sphi %s432_s17, %s14_s17   ;;  %s396_s16 = sphi %s430_s16, %s476_s16   ;;  %s392_s15 = sphi %s428_s15, %s475_s15  }
   0x3   : > { %p28_p1 = scmp.ge.s32.totalorder %s26_s18, 2  ;;  %p180_p2 = scmp.lt.s32.totalorder %s400_s17, 3 }
   0x5   : > { %s478_s18 = smov (%p28_p1, %s26_s18), 0  ;;  %p181_p3 = pnand %p346_p0, %p180_p2 }
   0x6   : > { %p210_p4 = scmp.lt.s32.totalorder (!%p181_p3), %s392_s15, 1 }
   0x7   : > { %184 = sbr.rel (%p181_p3) target bundleno = 156 (0x9c), region = 36 }
   0xc   : > { %v229_v0 = vld [vmem:[%s472_s2] sm:$0xff]  ;;  %v402_v1 = vmov 0   ;;  %s480_s15 = smov (!%p210_p4, %s392_s15), 1  ;;  %vm239_vm0 = vcmask 1043456   ;;  %vm235_vm1 = vcmask 64512   ;;  %vm266_vm3 = vcmask 517120  }
   0xd   : > { %377 = vset.pattern.permute.xlu0 %v402_v1  ;;  %s347_s21 = sshll.u32 %s480_s15, 3  ;;  %v227_v3 = vld [vmem:[%s471_s1] sm:$0xff]  ;;  %s348_s29 = sshll.u32 %s480_s15, 1 }
   0xe   : > { %232 = vperm.xlu0 %377, %v229_v0   ;;  %s216_s24 = scalar_lea.vmem %s470_s0, %s347_s21  ;;  %v257_v5 = vld [vmem:[%s473_s3] sm:$0xff]  ;;  %v228_v7 = vpack.c.bf16 %v227_v3, %v227_v3  ;;  %s223_s6 = scalar_lea.vmem %s474_s4, %s348_s29 }
   0xf   : > { %v225_v2 = vld [vmem:[%s216_s24] sm:$0xff] }
  0x10   : > { %v226_v4 = vpack.c.bf16 %v225_v2, %v225_v2 }
  0x12   : > { %v241_v6 = vsel %vm239_vm0, %v226_v4, 0 }
  0x13   : > { %250 = vmatpush.bf16.msra.mxu0 %v241_v6 }
  0x16   : > { %260 = vperm.xlu0 %377, %v257_v5   ;;  %349 = vmatmul.msk.bf16.vlgmr.msra.gmra.mxu0 %vm235_vm1, %v228_v7 }
  0x80   : > { %v233_v8 = vpop.permute.xlu0 %232 }
  0x88   : > { %v261_v11 = vpop.permute.xlu0 %260 }
  0x93   : > { %v252_v9 = vpop.f32.mrf.mxu0 }
  0x94   : > { %v253_v10 = vadd.f32 %v252_v9, %v233_v8 }
  0x96   : > { %vm256_vm2 = vcmp.ge.f32.partialorder %v253_v10, 0.0  ;;  %v263_v12 = vmul.f32 %v261_v11, %v253_v10 }
  0x98   : > { %v264_v13 = vsel %vm256_vm2, %v253_v10, %v263_v12 }
  0x99   : > { %v265_v14 = vpack.c.bf16 %v264_v13, %v264_v13 }
  0x9b   : > { %267 = vst.msk [vmem:[%s223_s6] sm:$0x3] %vm266_vm3, %v265_v14  ;;  %v254_v15 = vpop.f32.mrf.mxu0 }
  0x9c PF: > { %s14_s17 = sadd.s32 1, %s400_s17   ;;  %s475_s15 = smov %s396_s16 }
  0x9d   : > { %p11_p5 = scmp.ge.s32.totalorder %s14_s17, 4   ;;  %s476_s16 = smov %s478_s18 }
  0x9f   :  { %13 = sbr.rel (!%p11_p5) target bundleno = 2 (0x2), region = 66 }

// kernel: csnln_forward.14
= control target key start
LH: loop header
LB: loop body
LE: loop exit
PB: predicated region body
PF: predicated region fallthrough
CT: control target
= control target key end

     0   :  { %s1403_s12 = smov 0   ;;  %s1405_s13 = smov 0   ;;  %s1684_s0 = inlined_call_operand.vmem [shape: bf16[2,36,64], index: 0, kind: input, shape index: {}]   ;;  %s1685_s1 = inlined_call_operand.vmem [shape: bf16[2,36,256], index: 1, kind: input, shape index: {}]   ;;  %s1686_s2 = inlined_call_operand.vmem [shape: bf16[2,288,64], index: 2, kind: input, shape index: {}]   ;;  %s1687_s3 = inlined_call_operand.vmem [shape: f32[2,288,256], index: 3, kind: output, shape index: {}]  }
   0x1   :  { %s1407_s14 = smov 0   ;;  %s1409_s15 = smov 0  }
   0x2   :  { %s1411_s16 = smov 0   ;;  %s1413_s17 = smov 0  }
   0x3   :  { %s1415_s18 = smov 0  }
   0x4 LB: > { %s22_s19 = sadd.s32 1, %s1373_s16  ;;  %s25_s20 = sadd.s32 1, %s1377_s17  ;;  %s1381_s18 = sphi %s1415_s18, %s13_s18   ;;  %s1377_s17 = sphi %s1413_s17, %s1694_s17   ;;  %s1373_s16 = sphi %s1411_s16, %s1693_s16   ;;  %s1369_s15 = sphi %s1409_s15, %s1692_s15   ;;  %s1365_s14 = sphi %s1407_s14, %s1691_s14   ;;  %s1361_s13 = sphi %s1405_s13, %s1690_s13   ;;  %s1357_s12 = sphi %s1403_s12, %s1689_s12  }
   0x5   : > { %p23_p0 = scmp.ge.s32.totalorder %s22_s19, 2  ;;  %s1091_s21 = sadd.s32 4294967295, %s1381_s18  }
   0x6   : > { %p67_p1 = scmp.ne.s32.totalorder %s1361_s13, %s1357_s12  ;;  %p68_p2 = scmp.eq.s32.totalorder %s1381_s18, 0 }
   0x7   : > { %s1696_s19 = smov (%p23_p0, %s22_s19), 0  ;;  %s1698_s20 = smov (!%p23_p0, %s25_s20), %s1377_s17 }
   0x8   : > { %p27_p3 = scmp.ge.s32.totalorder %s1698_s20, 2  ;;  %p125_p4 = scmp.eq.s32.totalorder %s1091_s21, 3 }
   0x9   : > { %s56_s22 = ssub.s32 %s1373_s16, %s1696_s19  ;;  %p69_p5 = por %p68_p2, %p67_p1 }
   0xa   : > { %s1700_s20 = smov (%p27_p3, %s1698_s20), 0  ;;  %p1451_p6 = por %p125_p4, %p67_p1 }
   0xb   : > { %s55_s24 = ssub.s32 %s1377_s17, %s1700_s20  ;;  %s60_s26 = sadd.s32 1, %s1361_s13 }
   0xc   : > { %s57_s25 = sor.u32 %s56_s22, %s55_s24  ;;  %p1094_p8 = scmp.ge.s32.totalorder %s1381_s18, 4 }
   0xd   : > { %p58_p7 = scmp.eq.s32.totalorder %s57_s25, 0 }
   0xe   : > { %147 = sbr.rel (%p1094_p8) target bundleno = 31 (0x1f), region = 16 }
   0xf   : > { %s1459_s27 = scalar_select %p58_p7, %s1361_s13, %s60_s26  }
  0x13   : > { %158 = sbr.rel (!%p69_p5) target bundleno = 31 (0x1f), region = 24  ;;  %s160_s28 = sand.u32 (%p69_p5), 1, %s1361_s13  }
  0x14   : > { %s1242_s29 = smul.u32 (%p69_p5), 10, %s1377_s17 }
  0x15   : > { %s1241_s30 = smul.u32 (%p69_p5), 20, %s160_s28 }
  0x16   : > { %s164_s4 = sadd.s32 (%p69_p5), %s1373_s16, %s1242_s29 }
  0x17   : > { %s1095_s5 = sshll.u32 (%p69_p5), %s164_s4, 2  ;;  %s162_s9 = scalar_lea.vmem (%p69_p5), [#allocation2], %s1241_s30 }
  0x18   : > { %s166_s8 = scalar_lea.vmem %s1685_s1, %s1095_s5 }
  0x19   : > { %v183_v0 = vld [vmem:[%s166_s8] sm:$0xf]  ;;  %v185_v1 = vld [vmem:[%s166_s8 + $0x8] sm:$0xf]  ;;  %v187_v2 = vld [vmem:[%s166_s8 + $0x10] sm:$0xf] }
  0x1a   : > { %184 = vst [vmem:[%s162_s9] sm:$0xf] %v183_v0  ;;  %v189_v3 = vld [vmem:[%s166_s8 + $0x18] sm:$0xf]  ;;  %v191_v4 = vld [vmem:[%s166_s8 + $0x20] sm:$0xf] }
  0x1b   : > { %186 = vst [vmem:[%s162_s9 + $0x4] sm:$0xf] %v185_v1 }
  0x1c   : > { %188 = vst [vmem:[%s162_s9 + $0x8] sm:$0xf] %v187_v2 }
  0x1d   : > { %190 = vst [vmem:[%s162_s9 + $0xc] sm:$0xf] %v189_v3 }
  0x1e   : > { %192 = vst [vmem:[%s162_s9 + $0x10] sm:$0xf] %v191_v4 }
  0x1f PF: > { %p1096_p9 = scmp.ge.s32.totalorder %s1381_s18, 1  ;;  %p233_p10 = scmp.lt.s32.totalorder %s1381_s18, 5 }
  0x21   : > { %p234_p11 = pnand %p1096_p9, %p233_p10 }
  0x22   : > { %p272_p12 = scmp.lt.s32.totalorder (!%p234_p11), %s1369_s15, 1  ;;  %s240_s25 = sand.u32 (!%p234_p11), 1, %s1357_s12  }
  0x23   : > { %237 = sbr.rel (%p234_p11) target bundleno = 784 (0x310), region = 69 }
  0x24   : > { %s1243_s26 = smul.u32 (!%p234_p11), 20, %s240_s25 }
  0x25   : > { %s1244_s6 = smul.u32 (!%p234_p11), 288, %s240_s25 }
  0x26   : > { %s242_s28 = scalar_lea.vmem (!%p234_p11), [#allocation2], %s1243_s26 }
  0x27   : > { %s1544_s7 = scalar_lea.vmem (!%p234_p11), [#allocation3], %s1244_s6 }
  0x28   : > { %s1472_s10 = scalar_select %p272_p12, %s1369_s15, 1  ;;  %vm298_vm0 = vcmask 523264   ;;  %vm306_vm1 = vcmask 519168   ;;  %v355_v58 = vld [vmem:[%s242_s28 + $0x10] sm:$0x3]  ;;  %vm400_vm8 = vcmask 1041408  }
  0x29   : > { %v381_v59 = vunpack.c.l.b16 %v355_v58  ;;  %v1205_v62 = vld [vmem:[%s242_s28 + $0x8] sm:$0xff]  ;;  %v1204_v1 = vld [vmem:[%s242_s28] sm:$0xff]  ;;  %vm387_vm9 = vcmask 293888   ;;  %s1247_s12 = smul.u32 (%p1451_p6), 72, %s1369_s15 }
  0x2a   : > { %s1245_s11 = smul.u32 20, %s1472_s10 }
  0x2b   : > { %v384_v60 = vpack.c.b16 %v381_v59, %v381_v59  ;;  %s1246_s29 = smul.u32 144, %s1472_s10  ;;  %s819_s8 = sadd.s32 (%p1451_p6), %s1365_s14, %s1247_s12 }
  0x2c   : > { %s276_s24 = scalar_lea.vmem %s1684_s0, %s1245_s11  ;;  %s1201_s9 = sshll.u32 (%p1451_p6), %s819_s8, 3 }
  0x2d   : > { %v1225_v5 = vld [vmem:[%s276_s24] sm:$0xff]   ;;  %v1232_v6 = vld [vmem:[%s276_s24 + $0x8] sm:$0xff]   ;;  %v287_v7 = vld [vmem:[%s276_s24 + $0x10] sm:$0x3]  ;;  %v402_v61 = vsel %vm400_vm8, %v384_v60, 0  ;;  %s1504_s5 = scalar_lea.vmem %s1686_s2, %s1246_s29  ;;  %s1591_s23 = scalar_lea.vmem (%p1451_p6), %s1687_s3, %s1201_s9 }
  0x2e   : > { %v1226_v8 = vunpack.c.l.bf16 %v1225_v5  ;;  %v1227_v9 = vunpack.c.h.bf16 %v1225_v5  ;;  %v1478_v10 = vunpack.c.l.bf16 %v1232_v6  ;;  %v1480_v11 = vunpack.c.h.bf16 %v1232_v6  ;;  %409 = vmatpush.bf16.msra.mxu0 %v402_v61 }
  0x2f   : > { %v1482_v12 = vunpack.c.l.bf16 %v287_v7 }
  0x30   : > { %v293_v13 = vmul.f32 %v1226_v8, %v1226_v8  ;;  %v294_v14 = vmul.f32 %v1227_v9, %v1227_v9  ;;  %v295_v15 = vmul.f32 %v1478_v10, %v1478_v10  ;;  %v296_v16 = vmul.f32 %v1480_v11, %v1480_v11 }
  0x31   : > { %v297_v17 = vmul.f32 %v1482_v12, %v1482_v12 }
  0x32   : > { %v299_v18 = vsel %vm298_vm0, %v293_v13, 0.0  ;;  %v300_v19 = vsel %vm298_vm0, %v294_v14, 0.0  ;;  %v302_v20 = vsel %vm298_vm0, %v295_v15, 0.0  ;;  %v304_v22 = vsel %vm298_vm0, %v296_v16, 0.0  ;;  %410 = vmatpush.bf16.msra.mxu0 %v1205_v62 }
  0x33   : > { %v301_v21 = vadd.f32 %v300_v19, %v299_v18  ;;  %v307_v24 = vsel %vm306_vm1, %v297_v17, 0.0 }
  0x35   : > { %v303_v23 = vadd.f32 %v302_v20, %v301_v21 }
  0x36   : > { %411 = vmatpush.bf16.msra.mxu0 %v1204_v1 }
  0x37   : > { %v305_v25 = vadd.f32 %v304_v22, %v303_v23 }
  0x39   : > { %v308_v26 = vadd.f32 %v307_v24, %v305_v25 }
  0x3b   : > { %v309_v27 = vrot.slane %v308_v26, 4 }
  0x3d   : > { %v310_v28 = vadd.f32 %v309_v27, %v308_v26 }
  0x3f   : > { %v311_v29 = vrot.slane %v310_v28, 2 }
  0x41   : > { %v312_v30 = vadd.f32 %v311_v29, %v310_v28 }
  0x43   : > { %v313_v31 = vrot.slane %v312_v30, 1 }
  0x45   : > { %v314_v32 = vadd.f32 %v313_v31, %v312_v30 }
  0x47   : > { %1305 = vrsqrt.f32 %v314_v32  ;;  %vm322_vm2 = vcmp.eq.f32.partialorder %v314_v32, inf  ;;  %v325_v39 = vand.u32 2147483648, %v314_v32  ;;  %vm324_vm3 = vcmp.eq.f32.partialorder %v314_v32, 0.0 }
  0x4d   : > { %v1306_v33 = vpop.eup %1305 }
  0x4e   : > { %v316_v34 = vmul.f32 %v1306_v33, %v314_v32 }
  0x50   : > { %v317_v35 = vmul.f32 %v1306_v33, %v316_v34 }
  0x52   : > { %v318_v36 = vmul.f32 0.5, %v317_v35 }
  0x54   : > { %v319_v37 = vsub.f32 1.5, %v318_v36 }
  0x56   : > { %v320_v38 = vmul.f32 %v1306_v33, %v319_v37 }
  0x58   : > { %v321_v40 = vmul.f32 %v320_v38, %v314_v32 }
  0x5a   : > { %v323_v41 = vsel %vm322_vm2, %v314_v32, %v321_v40 }
  0x5b   : > { %v326_v42 = vsel %vm324_vm3, %v325_v39, %v323_v41 }
  0x5c   : > { %v327_v43 = vmax.f32 %v326_v42, 0.0001 }
  0x5e   : > { %1307 = vrcp.f32 %v327_v43  ;;  %v339_v46 = vand.u32 2147483648, %v327_v43  ;;  %vm333_vm4 = vweird.f32 %v327_v43  ;;  %v337_v48 = vand.u32 2147483647, %v327_v43 }
  0x60   : > { %v340_v50 = vor.u32 1.1754944e-38, %v339_v46  ;;  %vm338_vm7 = vcmp.eq.f32.partialorder %v337_v48, 8.507059e+37 }
  0x64   : > { %v1308_v44 = vpop.eup %1307 }
  0x65   : > { %v329_v45 = vmul.f32 %v1308_v44, %v327_v43  ;;  %vm334_vm5 = vweird.f32 %v1308_v44 }
  0x66   : > { %vm335_vm6 = vmor %vm333_vm4, %vm334_vm5 }
  0x67   : > { %v330_v47 = vsub.f32 1.0, %v329_v45 }
  0x69   : > { %v331_v49 = vmul.f32 %v1308_v44, %v330_v47 }
  0x6b   : > { %v332_v51 = vadd.f32 %v1308_v44, %v331_v49 }
  0x6d   : > { %v336_v52 = vsel %vm335_vm6, %v1308_v44, %v332_v51 }
  0x6e   : > { %v341_v53 = vsel %vm338_vm7, %v340_v50, %v336_v52 }
  0x6f   : > { %v342_v54 = vmul.f32 10.0, %v341_v53 }
  0x71   : > { %v343_v55 = vmul.f32 %v1226_v8, %v342_v54  ;;  %v344_v56 = vmul.f32 %v1227_v9, %v342_v54  ;;  %v345_v63 = vmul.f32 %v1478_v10, %v342_v54  ;;  %v346_v0 = vmul.f32 %v1480_v11, %v342_v54 }
  0x72   : > { %v347_v3 = vmul.f32 %v342_v54, %v1482_v12 }
  0x73   : > { %v348_v57 = vpack.c.bf16 %v344_v56, %v343_v55  ;;  %v349_v2 = vpack.c.bf16 %v346_v0, %v345_v63 }
  0x74   : > { %v350_v4 = vpack.c.bf16 %v347_v3, %v347_v3 }
  0x75   : > { %356 = vxpose.xlu0.c.b16.start [1/3] (short) (narrow) %v348_v57, 64 }
  0x85   : > { %357 = vxpose.xlu0.c.b16.cont [2/3] (short) (narrow) %v349_v2, 64 }
  0x95   : > { %358 = vxpose.xlu0.c.b16.end [3/3] (short) (narrow) %v350_v4, 64 }
 0x121   : > { %v364_v5 = vpop.trf.xlu0 }
 0x122   : > { %1107 = vmatmul.msk.bf16.vlgmr.msra.gmra.mxu0 %vm387_vm9, %v364_v5 }
 0x131   : > { %v365_v6 = vpop.trf.xlu0 }
 0x132   : > { %1108 = vmatmul.msk.bf16.gmra.mxu0 %vm387_vm9, %v365_v6 }
 0x141   : > { %v366_v7 = vpop.trf.xlu0 }
 0x142   : > { %1109 = vmatmul.msk.bf16.gmra.mxu0 %vm387_vm9, %v366_v7 }
 0x151   : > { %v367_v8 = vpop.trf.xlu0 }
 0x152   : > { %1110 = vmatmul.msk.bf16.gmra.mxu0 %vm387_vm9, %v367_v8 }
 0x19f   : > { %v413_v9 = vpop.f32.mrf.mxu0 }
 0x1a7   : > { %v415_v10 = vpop.f32.mrf.mxu0 }
 0x1af   : > { %v418_v11 = vpop.f32.mrf.mxu0 }
 0x1b7   : > { %v420_v13 = vpop.f32.mrf.mxu0 }
 0x1bf   : > { %v423_v14 = vpop.f32.mrf.mxu0 }
 0x1c0   : > { %v433_v18 = vmax.f32 %v413_v9, %v423_v14 }
 0x1c7   : > { %v425_v15 = vpop.f32.mrf.mxu0 }
 0x1c8   : > { %v434_v17 = vmax.f32 %v415_v10, %v425_v15 }
 0x1ca   : > { %v437_v21 = vmax.f32 %v433_v18, %v434_v17  ;;  %v1206_v17 = vld [vmem:[%s1504_s5] sm:$0xff] }
 0x1cb   : > { %v1218_v18 = vld [vmem:[%s1504_s5 + $0x60] sm:$0xff] }
 0x1cf   : > { %v428_v16 = vpop.f32.mrf.mxu0 }
 0x1d0   : > { %v435_v19 = vmax.f32 %v418_v11, %v428_v16 }
 0x1d7   : > { %v430_v12 = vpop.f32.mrf.mxu0 }
 0x1d8   : > { %v436_v20 = vmax.f32 %v420_v13, %v430_v12 }
 0x1da   : > { %v438_v22 = vmax.f32 %v435_v19, %v436_v20  ;;  %v1207_v19 = vld [vmem:[%s1504_s5 + $0x8] sm:$0xff]  ;;  %v1213_v20 = vld [vmem:[%s1504_s5 + $0x38] sm:$0xff] }
 0x1dc   : > { %v439_v23 = vmax.f32 %v437_v21, %v438_v22  ;;  %v1219_v21 = vld [vmem:[%s1504_s5 + $0x68] sm:$0xff]  ;;  %v1208_v22 = vld [vmem:[%s1504_s5 + $0x10] sm:$0xff] }
 0x1de   : > { %v440_v24 = vrot.slane %v439_v23, 4 }
 0x1e0   : > { %v441_v25 = vmax.f32 %v439_v23, %v440_v24  ;;  %v1214_v23 = vld [vmem:[%s1504_s5 + $0x40] sm:$0xff]  ;;  %v1220_v24 = vld [vmem:[%s1504_s5 + $0x70] sm:$0xff] }
 0x1e2   : > { %v442_v26 = vrot.slane %v441_v25, 2 }
 0x1e4   : > { %v443_v27 = vmax.f32 %v441_v25, %v442_v26  ;;  %v1209_v25 = vld [vmem:[%s1504_s5 + $0x18] sm:$0xff]  ;;  %v1215_v26 = vld [vmem:[%s1504_s5 + $0x48] sm:$0xff] }
 0x1e6   : > { %v444_v28 = vrot.slane %v443_v27, 1 }
 0x1e8   : > { %v445_v29 = vmax.f32 %v443_v27, %v444_v28  ;;  %v1221_v27 = vld [vmem:[%s1504_s5 + $0x78] sm:$0xff]  ;;  %v1210_v28 = vld [vmem:[%s1504_s5 + $0x20] sm:$0xff] }
 0x1ea   : > { %v446_v30 = vsub.f32 %v413_v9, %v445_v29  ;;  %v447_v31 = vsub.f32 %v415_v10, %v445_v29  ;;  %v448_v32 = vsub.f32 %v418_v11, %v445_v29  ;;  %v449_v33 = vsub.f32 %v420_v13, %v445_v29 }
 0x1eb   : > { %v450_v36 = vsub.f32 %v423_v14, %v445_v29  ;;  %v451_v38 = vsub.f32 %v425_v15, %v445_v29  ;;  %v452_v40 = vsub.f32 %v428_v16, %v445_v29  ;;  %v453_v42 = vsub.f32 %v430_v12, %v445_v29  ;;  %v1212_v12 = vld [vmem:[%s1504_s5 + $0x30] sm:$0xff] }
 0x1ec   : > { %v454_v34 = vmul.f32 1.442695, %v446_v30  ;;  %v456_v35 = vmul.f32 1.442695, %v447_v31  ;;  %v458_v37 = vmul.f32 1.442695, %v448_v32 }
 0x1ed   : > { %v460_v39 = vmul.f32 1.442695, %v449_v33  ;;  %v462_v41 = vmul.f32 1.442695, %v450_v36  ;;  %v464_v43 = vmul.f32 1.442695, %v451_v38 }
 0x1ee   : > { %1309 = vpow2.f32 %v454_v34  ;;  %v466_v46 = vmul.f32 1.442695, %v452_v40  ;;  %v468_v49 = vmul.f32 1.442695, %v453_v42  ;;  %v1216_v29 = vld [vmem:[%s1504_s5 + $0x50] sm:$0xff]  ;;  %v1222_v30 = vld [vmem:[%s1504_s5 + $0x80] sm:$0xff] }
 0x1ef   : > { %1311 = vpow2.f32 %v456_v35  ;;  %v1211_v31 = vld [vmem:[%s1504_s5 + $0x28] sm:$0xff]  ;;  %v1217_v32 = vld [vmem:[%s1504_s5 + $0x58] sm:$0xff] }
 0x1f0   : > { %1313 = vpow2.f32 %v458_v37  ;;  %v1223_v33 = vld [vmem:[%s1504_s5 + $0x88] sm:$0xff] }
 0x1f1   : > { %1315 = vpow2.f32 %v460_v39 }
 0x1f2   : > { %1317 = vpow2.f32 %v462_v41 }
 0x1f3   : > { %1319 = vpow2.f32 %v464_v43 }
 0x1f4   : > { %v1310_v44 = vpop.eup %1309  ;;  %1321 = vpow2.f32 %v466_v46 }
 0x1f5   : > { %v1312_v45 = vpop.eup %1311  ;;  %1323 = vpow2.f32 %v468_v49 }
 0x1f6   : > { %v470_v47 = vadd.f32 %v1312_v45, %v1310_v44  ;;  %v1314_v48 = vpop.eup %1313 }
 0x1f7   : > { %v1316_v51 = vpop.eup %1315 }
 0x1f8   : > { %v471_v50 = vadd.f32 %v1314_v48, %v470_v47  ;;  %v1318_v53 = vpop.eup %1317 }
 0x1f9   : > { %v1320_v55 = vpop.eup %1319 }
 0x1fa   : > { %v472_v52 = vadd.f32 %v1316_v51, %v471_v50  ;;  %v1322_v57 = vpop.eup %1321 }
 0x1fb   : > { %v1324_v59 = vpop.eup %1323 }
 0x1fc   : > { %v473_v54 = vadd.f32 %v1318_v53, %v472_v52 }
 0x1fe   : > { %v474_v56 = vadd.f32 %v1320_v55, %v473_v54 }
 0x200   : > { %v475_v58 = vadd.f32 %v1322_v57, %v474_v56 }
 0x202   : > { %v476_v60 = vadd.f32 %v1324_v59, %v475_v58 }
 0x204   : > { %v477_v61 = vrot.slane %v476_v60, 4 }
 0x206   : > { %v478_v62 = vadd.f32 %v477_v61, %v476_v60 }
 0x208   : > { %v479_v63 = vrot.slane %v478_v62, 2 }
 0x20a   : > { %v480_v0 = vadd.f32 %v479_v63, %v478_v62 }
 0x20c   : > { %v481_v1 = vrot.slane %v480_v0, 1 }
 0x20e   : > { %v482_v2 = vadd.f32 %v481_v1, %v480_v0 }
 0x210   : > { %1325 = vrcp.f32 %v482_v2 }
 0x216   : > { %v1326_v3 = vpop.eup %1325 }
 0x217   : > { %v490_v4 = vmul.f32 %v1326_v3, %v1322_v57  ;;  %v491_v5 = vmul.f32 %v1326_v3, %v1324_v59  ;;  %v488_v7 = vmul.f32 %v1326_v3, %v1318_v53  ;;  %v489_v8 = vmul.f32 %v1326_v3, %v1320_v55 }
 0x218   : > { %v486_v10 = vmul.f32 %v1326_v3, %v1314_v48  ;;  %v487_v11 = vmul.f32 %v1326_v3, %v1316_v51  ;;  %v484_v14 = vmul.f32 %v1326_v3, %v1310_v44  ;;  %v485_v15 = vmul.f32 %v1326_v3, %v1312_v45 }
 0x219   : > { %v531_v6 = vpack.c.bf16 %v491_v5, %v490_v4  ;;  %v530_v9 = vpack.c.bf16 %v489_v8, %v488_v7 }
 0x21a   : > { %v529_v13 = vpack.c.bf16 %v487_v11, %v486_v10  ;;  %v528_v16 = vpack.c.bf16 %v485_v15, %v484_v14 }
 0x21b   : > { %680 = vmatpush.bf16.msra.mxu1 %v531_v6  ;;  %1233 = vmatpush.bf16.msra.mxu2 %v531_v6 }
 0x21c   : > { %1234 = vmatpush.bf16.msra.mxu3 %v531_v6 }
 0x21f   : > { %681 = vmatpush.bf16.msra.mxu1 %v530_v9  ;;  %1235 = vmatpush.bf16.msra.mxu2 %v530_v9 }
 0x220   : > { %1236 = vmatpush.bf16.msra.mxu3 %v530_v9 }
 0x223   : > { %682 = vmatpush.bf16.msra.mxu1 %v529_v13  ;;  %1237 = vmatpush.bf16.msra.mxu2 %v529_v13 }
 0x224   : > { %1238 = vmatpush.bf16.msra.mxu3 %v529_v13 }
 0x227   : > { %683 = vmatpush.bf16.msra.mxu1 %v528_v16  ;;  %1239 = vmatpush.bf16.msra.mxu2 %v528_v16 }
 0x228   : > { %1240 = vmatpush.bf16.msra.mxu3 %v528_v16 }
 0x22a   : > { %1183 = vmatmul.msk.bf16.vlgmr.msra.gmra.mxu1 %vm298_vm0, %v1206_v17  ;;  %1189 = vmatmul.msk.bf16.vlgmr.msra.gmra.mxu2 %vm298_vm0, %v1212_v12 }
 0x22b   : > { %1195 = vmatmul.msk.bf16.vlgmr.msra.gmra.mxu3 %vm298_vm0, %v1218_v18 }
 0x23a   : > { %1184 = vmatmul.msk.bf16.gmra.mxu1 %vm298_vm0, %v1207_v19  ;;  %1190 = vmatmul.msk.bf16.gmra.mxu2 %vm298_vm0, %v1213_v20 }
 0x23b   : > { %1196 = vmatmul.msk.bf16.gmra.mxu3 %vm298_vm0, %v1219_v21 }
 0x24a   : > { %1185 = vmatmul.msk.bf16.gmra.mxu1 %vm298_vm0, %v1208_v22  ;;  %1191 = vmatmul.msk.bf16.gmra.mxu2 %vm298_vm0, %v1214_v23 }
 0x24b   : > { %1197 = vmatmul.msk.bf16.gmra.mxu3 %vm298_vm0, %v1220_v24 }
 0x25a   : > { %1186 = vmatmul.msk.bf16.gmra.mxu1 %vm298_vm0, %v1209_v25  ;;  %1192 = vmatmul.msk.bf16.gmra.mxu2 %vm298_vm0, %v1215_v26 }
 0x25b   : > { %1198 = vmatmul.msk.bf16.gmra.mxu3 %vm298_vm0, %v1221_v27 }
 0x26a   : > { %1187 = vmatmul.msk.bf16.gmra.mxu1 %vm298_vm0, %v1210_v28  ;;  %1193 = vmatmul.msk.bf16.gmra.mxu2 %vm298_vm0, %v1216_v29 }
 0x26b   : > { %1199 = vmatmul.msk.bf16.gmra.mxu3 %vm298_vm0, %v1222_v30 }
 0x27a   : > { %1188 = vmatmul.msk.bf16.gmra.mxu1 %vm298_vm0, %v1211_v31  ;;  %1194 = vmatmul.msk.bf16.gmra.mxu2 %vm298_vm0, %v1217_v32 }
 0x27b   : > { %1200 = vmatmul.msk.bf16.gmra.mxu3 %vm298_vm0, %v1223_v33 }
 0x2a7   : > { %v685_v34 = vpop.f32.mrf.mxu1 }
 0x2a8   : > { %775 = vst [vmem:[%s1544_s7] sm:$0xff] %v685_v34 }
 0x2ad   : > { %v715_v35 = vpop.f32.mrf.mxu2 }
 0x2ae   : > { %787 = vst [vmem:[%s1544_s7 + $0x60] sm:$0xff] %v715_v35  ;;  %v745_v36 = vpop.f32.mrf.mxu3 }
 0x2af   : > { %799 = vst [vmem:[%s1544_s7 + $0xc0] sm:$0xff] %v745_v36  ;;  %v687_v37 = vpop.f32.mrf.mxu1  ;;  %v920_v6 = vld [vmem:[%s1544_s7] sm:$0xff] (%p1451_p6) }
 0x2b0   : > { %776 = vst [vmem:[%s1544_s7 + $0x8] sm:$0xff] %v687_v37 }
 0x2b1   : > { %921 = vst [vmem:[%s1591_s23] sm:$0xff] (%p1451_p6), %v920_v6 }
 0x2b5   : > { %v717_v38 = vpop.f32.mrf.mxu2  ;;  %v944_v18 = vld [vmem:[%s1544_s7 + $0x60] sm:$0xff] (%p1451_p6) }
 0x2b6   : > { %788 = vst [vmem:[%s1544_s7 + $0x68] sm:$0xff] %v717_v38  ;;  %v747_v39 = vpop.f32.mrf.mxu3  ;;  %v968_v30 = vld [vmem:[%s1544_s7 + $0xc0] sm:$0xff] (%p1451_p6) }
 0x2b7   : > { %800 = vst [vmem:[%s1544_s7 + $0xc8] sm:$0xff] %v747_v39  ;;  %v690_v40 = vpop.f32.mrf.mxu1  ;;  %v922_v7 = vld [vmem:[%s1544_s7 + $0x8] sm:$0xff] (%p1451_p6) }
 0x2b8   : > { %777 = vst [vmem:[%s1544_s7 + $0x10] sm:$0xff] %v690_v40 }
 0x2b9   : > { %923 = vst [vmem:[%s1591_s23 + $0x10] sm:$0xff] (%p1451_p6), %v922_v7 }
 0x2ba   : > { %945 = vst [vmem:[%s1591_s23 + $0xc0] sm:$0xff] (%p1451_p6), %v944_v18 }
 0x2bb   : > { %969 = vst [vmem:[%s1591_s23 + $0x180] sm:$0xff] (%p1451_p6), %v968_v30 }
 0x2bd   : > { %v720_v41 = vpop.f32.mrf.mxu2  ;;  %v946_v19 = vld [vmem:[%s1544_s7 + $0x68] sm:$0xff] (%p1451_p6) }
 0x2be   : > { %789 = vst [vmem:[%s1544_s7 + $0x70] sm:$0xff] %v720_v41  ;;  %v750_v42 = vpop.f32.mrf.mxu3  ;;  %v970_v31 = vld [vmem:[%s1544_s7 + $0xc8] sm:$0xff] (%p1451_p6) }
 0x2bf   : > { %801 = vst [vmem:[%s1544_s7 + $0xd0] sm:$0xff] %v750_v42  ;;  %v692_v43 = vpop.f32.mrf.mxu1  ;;  %v924_v8 = vld [vmem:[%s1544_s7 + $0x10] sm:$0xff] (%p1451_p6) }
 0x2c0   : > { %778 = vst [vmem:[%s1544_s7 + $0x18] sm:$0xff] %v692_v43 }
 0x2c1   : > { %925 = vst [vmem:[%s1591_s23 + $0x20] sm:$0xff] (%p1451_p6), %v924_v8 }
 0x2c2   : > { %947 = vst [vmem:[%s1591_s23 + $0xd0] sm:$0xff] (%p1451_p6), %v946_v19 }
 0x2c3   : > { %971 = vst [vmem:[%s1591_s23 + $0x190] sm:$0xff] (%p1451_p6), %v970_v31 }
 0x2c5   : > { %v722_v44 = vpop.f32.mrf.mxu2  ;;  %v948_v20 = vld [vmem:[%s1544_s7 + $0x70] sm:$0xff] (%p1451_p6) }
 0x2c6   : > { %790 = vst [vmem:[%s1544_s7 + $0x78] sm:$0xff] %v722_v44  ;;  %v752_v45 = vpop.f32.mrf.mxu3  ;;  %v972_v32 = vld [vmem:[%s1544_s7 + $0xd0] sm:$0xff] (%p1451_p6) }
 0x2c7   : > { %802 = vst [vmem:[%s1544_s7 + $0xd8] sm:$0xff] %v752_v45  ;;  %v695_v46 = vpop.f32.mrf.mxu1  ;;  %v926_v9 = vld [vmem:[%s1544_s7 + $0x18] sm:$0xff] (%p1451_p6) }
 0x2c8   : > { %779 = vst [vmem:[%s1544_s7 + $0x20] sm:$0xff] %v695_v46 }
 0x2c9   : > { %927 = vst [vmem:[%s1591_s23 + $0x30] sm:$0xff] (%p1451_p6), %v926_v9 }
 0x2ca   : > { %949 = vst [vmem:[%s1591_s23 + $0xe0] sm:$0xff] (%p1451_p6), %v948_v20 }
 0x2cb   : > { %973 = vst [vmem:[%s1591_s23 + $0x1a0] sm:$0xff] (%p1451_p6), %v972_v32 }
 0x2cd   : > { %v725_v47 = vpop.f32.mrf.mxu2  ;;  %v950_v21 = vld [vmem:[%s1544_s7 + $0x78] sm:$0xff] (%p1451_p6) }
 0x2ce   : > { %791 = vst [vmem:[%s1544_s7 + $0x80] sm:$0xff] %v725_v47  ;;  %v755_v48 = vpop.f32.mrf.mxu3  ;;  %v974_v33 = vld [vmem:[%s1544_s7 + $0xd8] sm:$0xff] (%p1451_p6) }
 0x2cf   : > { %803 = vst [vmem:[%s1544_s7 + $0xe0] sm:$0xff] %v755_v48  ;;  %v697_v49 = vpop.f32.mrf.mxu1  ;;  %v928_v10 = vld [vmem:[%s1544_s7 + $0x20] sm:$0xff] (%p1451_p6) }
 0x2d0   : > { %780 = vst [vmem:[%s1544_s7 + $0x28] sm:$0xff] %v697_v49 }
 0x2d1   : > { %929 = vst [vmem:[%s1591_s23 + $0x40] sm:$0xff] (%p1451_p6), %v928_v10 }
 0x2d2   : > { %951 = vst [vmem:[%s1591_s23 + $0xf0] sm:$0xff] (%p1451_p6), %v950_v21 }
 0x2d3   : > { %975 = vst [vmem:[%s1591_s23 + $0x1b0] sm:$0xff] (%p1451_p6), %v974_v33 }
 0x2d5   : > { %v727_v50 = vpop.f32.mrf.mxu2  ;;  %v952_v22 = vld [vmem:[%s1544_s7 + $0x80] sm:$0xff] (%p1451_p6) }
 0x2d6   : > { %792 = vst [vmem:[%s1544_s7 + $0x88] sm:$0xff] %v727_v50  ;;  %v757_v51 = vpop.f32.mrf.mxu3  ;;  %v976_v34 = vld [vmem:[%s1544_s7 + $0xe0] sm:$0xff] (%p1451_p6) }
 0x2d7   : > { %804 = vst [vmem:[%s1544_s7 + $0xe8] sm:$0xff] %v757_v51  ;;  %v700_v52 = vpop.f32.mrf.mxu1  ;;  %v930_v11 = vld [vmem:[%s1544_s7 + $0x28] sm:$0xff] (%p1451_p6) }
 0x2d8   : > { %781 = vst [vmem:[%s1544_s7 + $0x30] sm:$0xff] %v700_v52 }
 0x2d9   : > { %931 = vst [vmem:[%s1591_s23 + $0x50] sm:$0xff] (%p1451_p6), %v930_v11 }
 0x2da   : > { %953 = vst [vmem:[%s1591_s23 + $0x100] sm:$0xff] (%p1451_p6), %v952_v22 }
 0x2db   : > { %977 = vst [vmem:[%s1591_s23 + $0x1c0] sm:$0xff] (%p1451_p6), %v976_v34 }
 0x2dd   : > { %v730_v53 = vpop.f32.mrf.mxu2  ;;  %v954_v23 = vld [vmem:[%s1544_s7 + $0x88] sm:$0xff] (%p1451_p6) }
 0x2de   : > { %793 = vst [vmem:[%s1544_s7 + $0x90] sm:$0xff] %v730_v53  ;;  %v760_v54 = vpop.f32.mrf.mxu3  ;;  %v978_v35 = vld [vmem:[%s1544_s7 + $0xe8] sm:$0xff] (%p1451_p6) }
 0x2df   : > { %805 = vst [vmem:[%s1544_s7 + $0xf0] sm:$0xff] %v760_v54  ;;  %v702_v55 = vpop.f32.mrf.mxu1  ;;  %v932_v13 = vld [vmem:[%s1544_s7 + $0x30] sm:$0xff] (%p1451_p6) }
 0x2e0   : > { %782 = vst [vmem:[%s1544_s7 + $0x38] sm:$0xff] %v702_v55 }
 0x2e1   : > { %933 = vst [vmem:[%s1591_s23 + $0x60] sm:$0xff] (%p1451_p6), %v932_v13 }
 0x2e2   : > { %955 = vst [vmem:[%s1591_s23 + $0x110] sm:$0xff] (%p1451_p6), %v954_v23 }
 0x2e3   : > { %979 = vst [vmem:[%s1591_s23 + $0x1d0] sm:$0xff] (%p1451_p6), %v978_v35 }
 0x2e5   : > { %v732_v56 = vpop.f32.mrf.mxu2  ;;  %v956_v24 = vld [vmem:[%s1544_s7 + $0x90] sm:$0xff] (%p1451_p6) }
 0x2e6   : > { %794 = vst [vmem:[%s1544_s7 + $0x98] sm:$0xff] %v732_v56  ;;  %v762_v57 = vpop.f32.mrf.mxu3  ;;  %v980_v36 = vld [vmem:[%s1544_s7 + $0xf0] sm:$0xff] (%p1451_p6) }
 0x2e7   : > { %806 = vst [vmem:[%s1544_s7 + $0xf8] sm:$0xff] %v762_v57  ;;  %v705_v58 = vpop.f32.mrf.mxu1  ;;  %v934_v14 = vld [vmem:[%s1544_s7 + $0x38] sm:$0xff] (%p1451_p6) }
 0x2e8   : > { %783 = vst [vmem:[%s1544_s7 + $0x40] sm:$0xff] %v705_v58 }
 0x2e9   : > { %935 = vst [vmem:[%s1591_s23 + $0x70] sm:$0xff] (%p1451_p6), %v934_v14 }
 0x2ea   : > { %957 = vst [vmem:[%s1591_s23 + $0x120] sm:$0xff] (%p1451_p6), %v956_v24 }
 0x2eb   : > { %981 = vst [vmem:[%s1591_s23 + $0x1e0] sm:$0xff] (%p1451_p6), %v980_v36 }
 0x2ed   : > { %v735_v59 = vpop.f32.mrf.mxu2  ;;  %v958_v25 = vld [vmem:[%s1544_s7 + $0x98] sm:$0xff] (%p1451_p6) }
 0x2ee   : > { %795 = vst [vmem:[%s1544_s7 + $0xa0] sm:$0xff] %v735_v59  ;;  %v765_v60 = vpop.f32.mrf.mxu3  ;;  %v982_v37 = vld [vmem:[%s1544_s7 + $0xf8] sm:$0xff] (%p1451_p6) }
 0x2ef   : > { %807 = vst [vmem:[%s1544_s7 + $0x100] sm:$0xff] %v765_v60  ;;  %v707_v61 = vpop.f32.mrf.mxu1  ;;  %v936_v15 = vld [vmem:[%s1544_s7 + $0x40] sm:$0xff] (%p1451_p6) }
 0x2f0   : > { %784 = vst [vmem:[%s1544_s7 + $0x48] sm:$0xff] %v707_v61 }
 0x2f1   : > { %937 = vst [vmem:[%s1591_s23 + $0x80] sm:$0xff] (%p1451_p6), %v936_v15 }
 0x2f2   : > { %959 = vst [vmem:[%s1591_s23 + $0x130] sm:$0xff] (%p1451_p6), %v958_v25 }
 0x2f3   : > { %983 = vst [vmem:[%s1591_s23 + $0x1f0] sm:$0xff] (%p1451_p6), %v982_v37 }
 0x2f5   : > { %v737_v62 = vpop.f32.mrf.mxu2  ;;  %v960_v26 = vld [vmem:[%s1544_s7 + $0xa0] sm:$0xff] (%p1451_p6) }
 0x2f6   : > { %796 = vst [vmem:[%s1544_s7 + $0xa8] sm:$0xff] %v737_v62  ;;  %v767_v63 = vpop.f32.mrf.mxu3  ;;  %v984_v38 = vld [vmem:[%s1544_s7 + $0x100] sm:$0xff] (%p1451_p6) }
 0x2f7   : > { %808 = vst [vmem:[%s1544_s7 + $0x108] sm:$0xff] %v767_v63  ;;  %v710_v0 = vpop.f32.mrf.mxu1  ;;  %v938_v16 = vld [vmem:[%s1544_s7 + $0x48] sm:$0xff] (%p1451_p6) }
 0x2f8   : > { %785 = vst [vmem:[%s1544_s7 + $0x50] sm:$0xff] %v710_v0 }
 0x2f9   : > { %939 = vst [vmem:[%s1591_s23 + $0x90] sm:$0xff] (%p1451_p6), %v938_v16 }
 0x2fa   : > { %961 = vst [vmem:[%s1591_s23 + $0x140] sm:$0xff] (%p1451_p6), %v960_v26 }
 0x2fb   : > { %985 = vst [vmem:[%s1591_s23 + $0x200] sm:$0xff] (%p1451_p6), %v984_v38 }
 0x2fd   : > { %v740_v1 = vpop.f32.mrf.mxu2  ;;  %v962_v27 = vld [vmem:[%s1544_s7 + $0xa8] sm:$0xff] (%p1451_p6) }
 0x2fe   : > { %797 = vst [vmem:[%s1544_s7 + $0xb0] sm:$0xff] %v740_v1  ;;  %v770_v2 = vpop.f32.mrf.mxu3  ;;  %v986_v39 = vld [vmem:[%s1544_s7 + $0x108] sm:$0xff] (%p1451_p6) }
 0x2ff   : > { %809 = vst [vmem:[%s1544_s7 + $0x110] sm:$0xff] %v770_v2  ;;  %v712_v3 = vpop.f32.mrf.mxu1  ;;  %v940_v17 = vld [vmem:[%s1544_s7 + $0x50] sm:$0xff] (%p1451_p6) }
 0x300   : > { %786 = vst [vmem:[%s1544_s7 + $0x58] sm:$0xff] %v712_v3 }
 0x301   : > { %941 = vst [vmem:[%s1591_s23 + $0xa0] sm:$0xff] (%p1451_p6), %v940_v17 }
 0x302   : > { %963 = vst [vmem:[%s1591_s23 + $0x150] sm:$0xff] (%p1451_p6), %v962_v27 }
 0x303   : > { %817 = sbr.rel (!%p1451_p6) target bundleno = 784 (0x310), region = 77  ;;  %987 = vst [vmem:[%s1591_s23 + $0x210] sm:$0xff] (%p1451_p6), %v986_v39 }
 0x305   : > { %v742_v4 = vpop.f32.mrf.mxu2  ;;  %v964_v28 = vld [vmem:[%s1544_s7 + $0xb0] sm:$0xff] (%p1451_p6) }
 0x306   : > { %798 = vst [vmem:[%s1544_s7 + $0xb8] sm:$0xff] %v742_v4  ;;  %v772_v5 = vpop.f32.mrf.mxu3  ;;  %v988_v40 = vld [vmem:[%s1544_s7 + $0x110] sm:$0xff] (%p1451_p6) }
 0x307   : > { %810 = vst [vmem:[%s1544_s7 + $0x118] sm:$0xff] %v772_v5  ;;  %v942_v12 = vld [vmem:[%s1544_s7 + $0x58] sm:$0xff] (%p1451_p6) }
 0x308   : > { %943 = vst [vmem:[%s1591_s23 + $0xb0] sm:$0xff] %v942_v12 }
 0x309   : > { %965 = vst [vmem:[%s1591_s23 + $0x160] sm:$0xff] %v964_v28 }
 0x30a   : > { %989 = vst [vmem:[%s1591_s23 + $0x220] sm:$0xff] %v988_v40 }
 0x30d   : > { %v966_v29 = vld [vmem:[%s1544_s7 + $0xb8] sm:$0xff] }
 0x30e   : > { %967 = vst [vmem:[%s1591_s23 + $0x170] sm:$0xff] %v966_v29  ;;  %v990_v41 = vld [vmem:[%s1544_s7 + $0x118] sm:$0xff] }
 0x30f   : > { %991 = vst [vmem:[%s1591_s23 + $0x230] sm:$0xff] %v990_v41 }
 0x310 PF: > { %s13_s18 = sadd.s32 1, %s1381_s18   ;;  %s1689_s12 = smov %s1361_s13 }
 0x311   : > { %p10_p13 = scmp.ge.s32.totalorder %s13_s18, 6   ;;  %s1690_s13 = smov %s1459_s27 }
 0x312   : > { %s1691_s14 = smov %s1373_s16  ;;  %s1692_s15 = smov %s1377_s17 }
 0x313   : > { %s1693_s16 = smov %s1696_s19  ;;  %s1694_s17 = smov %s1700_s20 }
 0x314   :  { %12 = sbr.rel (!%p10_p13) target bundleno = 4 (0x4), region = 152 }

// kernel: csnln_forward.10
= control target key start
LH: loop header
LB: loop body
LE: loop exit
PB: predicated region body
PF: predicated region fallthrough
CT: control target
= control target key end

     0   :  { %s771_s21 = smov 0   ;;  %s773_s22 = smov 0   ;;  %s848_s0 = inlined_call_operand.vmem [shape: f32[2,8,256], index: 0, kind: input, shape index: {}]   ;;  %s849_s1 = inlined_call_operand.vmem [shape: f32[24,8], index: 1, kind: input, shape index: {}]   ;;  %s850_s2 = inlined_call_operand.vmem [shape: f32[24,1], index: 2, kind: input, shape index: {}]   ;;  %s851_s3 = inlined_call_operand.vmem [shape: f32[24,1], index: 3, kind: input, shape index: {}]   ;;  %s852_s4 = inlined_call_operand.vmem [shape: bf16[2,4,256], index: 4, kind: output, shape index: {0}]   ;;  %s853_s5 = inlined_call_operand.vmem [shape: bf16[2,4,256], index: 5, kind: output, shape index: {1}]   ;;  %s854_s6 = inlined_call_operand.vmem [shape: bf16[2,8,256], index: 6, kind: output, shape index: {2}]  }
   0x1   :  { %s775_s23 = smov 0  }
   0x2 LB: > { %s29_s24 = sadd.s32 1, %s729_s22  ;;  %p662_p0 = scmp.ge.s32.totalorder %s733_s23, 1  ;;  %s733_s23 = sphi %s775_s23, %s17_s23   ;;  %s729_s22 = sphi %s773_s22, %s856_s22   ;;  %s725_s21 = sphi %s771_s21, %s855_s21  }
   0x3   : > { %p31_p1 = scmp.ge.s32.totalorder %s29_s24, 2  ;;  %p242_p2 = scmp.lt.s32.totalorder %s733_s23, 3 }
   0x5   : > { %s858_s24 = smov (%p31_p1, %s29_s24), 0  ;;  %p243_p3 = pnand %p662_p0, %p242_p2 }
   0x6   : > { %p299_p4 = scmp.lt.s32.totalorder (!%p243_p3), %s725_s21, 1 }
   0x7   : > { %246 = sbr.rel (%p243_p3) target bundleno = 169 (0xa9), region = 36 }
   0xc   : > { %v348_v0 = vld [vmem:[%s850_s2] sm:$0xff]  ;;  %s860_s21 = smov (!%p299_p4, %s725_s21), 1  ;;  %v735_v2 = vmov 0   ;;  %v350_v3 = vld [vmem:[%s850_s2 + $0x10] sm:$0xff]  ;;  %v344_v5 = vld [vmem:[%s849_s1 + $0x8] sm:$0xff]  ;;  %vm373_vm0 = vcmask 1043456  }
   0xd   : > { %v422_v1 = vld [vmem:[%s851_s3] sm:$0xff]  ;;  %708 = vset.pattern.permute.xlu0 %v735_v2  ;;  %709 = vset.pattern.permute.xlu1 %v735_v2  ;;  %s677_s7 = sshll.u32 %s860_s21, 4  ;;  %v345_v8 = vld [vmem:[%s849_s1 + $0x10] sm:$0xff]  ;;  %v349_v15 = vld [vmem:[%s850_s2 + $0x8] sm:$0xff]  ;;  %vm366_vm1 = vcmask 64512   ;;  %s678_s27 = sshll.u32 %s860_s21, 2 }
   0xe   : > { %353 = vperm.xlu0 %708, %v348_v0   ;;  %427 = vperm.xlu1 %709, %v422_v1   ;;  %s306_s10 = scalar_lea.vmem %s848_s0, %s677_s7  ;;  %v343_v4 = vld [vmem:[%s849_s1] sm:$0xff]  ;;  %v347_v14 = vpack.c.bf16 %v345_v8, %v345_v8  ;;  %v423_v16 = vld [vmem:[%s851_s3 + $0x8] sm:$0xff]  ;;  %v424_v17 = vld [vmem:[%s851_s3 + $0x10] sm:$0xff]  ;;  %vm455_vm4 = vcmask 1041408   ;;  %s316_s30 = scalar_lea.vmem %s852_s4, %s678_s27 }
   0xf   : > { %710 = vset.pattern.permute.xlu2 %v735_v2  ;;  %v339_v6 = vld [vmem:[%s306_s10] sm:$0xff]  ;;  %v340_v7 = vld [vmem:[%s306_s10 + $0x8] sm:$0xff]  ;;  %v346_v13 = vpack.c.bf16 %v344_v5, %v343_v4  ;;  %s680_s7 = sshll.u32 %s860_s21, 3  ;;  %s326_s13 = scalar_lea.vmem %s853_s5, %s678_s27 }
  0x10   : > { %363 = vperm.xlu2 %710, %v350_v3   ;;  %v341_v9 = vpack.c.bf16 %v339_v6, %v339_v6  ;;  %v342_v10 = vpack.c.bf16 %v340_v7, %v340_v7  ;;  %s336_s10 = scalar_lea.vmem %s854_s6, %s680_s7 }
  0x12   : > { %v375_v11 = vsel %vm373_vm0, %v341_v9, 0  ;;  %v378_v12 = vsel %vm373_vm0, %v342_v10, 0 }
  0x13   : > { %387 = vmatpush.bf16.msra.mxu0 %v375_v11  ;;  %681 = vmatpush.bf16.msra.mxu2 %v375_v11 }
  0x14   : > { %405 = vmatpush.bf16.msra.mxu1 %v378_v12  ;;  %682 = vmatpush.bf16.msra.mxu3 %v378_v12 }
  0x16   : > { %358 = vperm.xlu0 %708, %v349_v15   ;;  %432 = vperm.xlu1 %709, %v423_v16  }
  0x17   : > { %671 = vmatmul.msk.bf16.vlgmr.msra.gmra.mxu0 %vm366_vm1, %v346_v13  ;;  %672 = vmatmul.msk.bf16.vlgmr.msra.gmra.mxu2 %vm366_vm1, %v347_v14 }
  0x18   : > { %673 = vmatmul.msk.bf16.vlgmr.msra.gmra.mxu1 %vm366_vm1, %v346_v13  ;;  %674 = vmatmul.msk.bf16.vlgmr.msra.gmra.mxu3 %vm366_vm1, %v347_v14 }
  0x19   : > { %437 = vperm.xlu2 %710, %v424_v17  }
  0x6a   : > { %v364_v18 = vpop.permute.xlu2 %363 }
  0x73   : > { %v438_v31 = vpop.permute.xlu2 %437 }
  0x80   : > { %v354_v19 = vpop.permute.xlu0 %353  ;;  %v428_v20 = vpop.permute.xlu1 %427 }
  0x88   : > { %v359_v34 = vpop.permute.xlu0 %358  ;;  %v433_v41 = vpop.permute.xlu1 %432 }
  0x94   : > { %v389_v21 = vpop.f32.mrf.mxu0 }
  0x95   : > { %v390_v22 = vadd.f32 %v389_v21, %v354_v19  ;;  %v407_v23 = vpop.f32.mrf.mxu1 }
  0x96   : > { %v408_v24 = vadd.f32 %v407_v23, %v354_v19 }
  0x97   : > { %vm416_vm2 = vcmp.ge.f32.partialorder %v390_v22, 0.0  ;;  %v440_v25 = vmul.f32 %v428_v20, %v390_v22 }
  0x98   : > { %vm417_vm3 = vcmp.ge.f32.partialorder %v408_v24, 0.0  ;;  %v441_v26 = vmul.f32 %v428_v20, %v408_v24 }
  0x99   : > { %v446_v27 = vsel %vm416_vm2, %v390_v22, %v440_v25 }
  0x9a   : > { %v447_v28 = vsel %vm417_vm3, %v408_v24, %v441_v26  ;;  %v394_v29 = vpop.f32.mrf.mxu2 }
  0x9b   : > { %v452_v30 = vpack.c.bf16 %v447_v28, %v446_v27  ;;  %v395_v32 = vadd.f32 %v394_v29, %v364_v18  ;;  %v412_v33 = vpop.f32.mrf.mxu3 }
  0x9c   : > { %v413_v35 = vadd.f32 %v412_v33, %v364_v18  ;;  %v391_v36 = vpop.f32.mrf.mxu0 }
  0x9d   : > { %v454_v37 = vrot.slane %v452_v30, 2  ;;  %vm420_vm5 = vcmp.ge.f32.partialorder %v395_v32, 0.0  ;;  %v444_v38 = vmul.f32 %v438_v31, %v395_v32  ;;  %v392_v39 = vadd.f32 %v391_v36, %v359_v34  ;;  %v409_v40 = vpop.f32.mrf.mxu1 }
  0x9e   : > { %vm421_vm6 = vcmp.ge.f32.partialorder %v413_v35, 0.0  ;;  %v445_v42 = vmul.f32 %v438_v31, %v413_v35  ;;  %v410_v43 = vadd.f32 %v409_v40, %v359_v34 }
  0x9f   : > { %v458_v44 = vsel %vm455_vm4, %v452_v30, %v454_v37  ;;  %v450_v45 = vsel %vm420_vm5, %v395_v32, %v444_v38  ;;  %vm418_vm7 = vcmp.ge.f32.partialorder %v392_v39, 0.0  ;;  %v442_v46 = vmul.f32 %v433_v41, %v392_v39 }
  0xa0   : > { %460 = vst [vmem:[%s316_s30] sm:$0xf] %v458_v44  ;;  %v451_v47 = vsel %vm421_vm6, %v413_v35, %v445_v42  ;;  %vm419_vm8 = vcmp.ge.f32.partialorder %v410_v43, 0.0  ;;  %v443_v48 = vmul.f32 %v433_v41, %v410_v43 }
  0xa1   : > { %v469_v49 = vpack.c.bf16 %v451_v47, %v450_v45  ;;  %v448_v50 = vsel %vm418_vm7, %v392_v39, %v442_v46 }
  0xa2   : > { %v449_v51 = vsel %vm419_vm8, %v410_v43, %v443_v48  ;;  %v396_v52 = vpop.f32.mrf.mxu2 }
  0xa3   : > { %470 = vst [vmem:[%s336_s10] sm:$0xff] %v469_v49  ;;  %v461_v53 = vpack.c.bf16 %v449_v51, %v448_v50  ;;  %v414_v54 = vpop.f32.mrf.mxu3 }
  0xa5   : > { %v463_v55 = vrot.slane %v461_v53, 2 }
  0xa7   : > { %v466_v56 = vsel %vm455_vm4, %v461_v53, %v463_v55 }
  0xa8   : > { %468 = vst [vmem:[%s326_s13] sm:$0xf] %v466_v56 }
  0xa9 PF: > { %s17_s23 = sadd.s32 1, %s733_s23   ;;  %s855_s21 = smov %s729_s22 }
  0xaa   : > { %p14_p5 = scmp.ge.s32.totalorder %s17_s23, 4   ;;  %s856_s22 = smov %s858_s24 }
  0xac   :  { %16 = sbr.rel (!%p14_p5) target bundleno = 2 (0x2), region = 90 }

// kernel: csnln_forward.11
= control target key start
LH: loop header
LB: loop body
LE: loop exit
PB: predicated region body
PF: predicated region fallthrough
CT: control target
= control target key end

     0   :  { %s983_s12 = smov 0   ;;  %s985_s13 = smov 0   ;;  %s1323_s0 = inlined_call_operand.vmem [shape: bf16[2,4,256], index: 0, kind: input, shape index: {}]   ;;  %s1324_s1 = inlined_call_operand.vmem [shape: bf16[2,8,256], index: 1, kind: input, shape index: {}]   ;;  %s1325_s2 = inlined_call_operand.vmem [shape: bf16[2,4,256], index: 2, kind: input, shape index: {}]   ;;  %s1326_s3 = inlined_call_operand.vmem [shape: f32[2,8,256], index: 3, kind: output, shape index: {}]  }
   0x1   :  { %s987_s14 = smov 0   ;;  %s989_s15 = smov 0  }
   0x2   :  { %s991_s16 = smov 0  }
   0x3 LB: > { %s22_s17 = sadd.s32 1, %s953_s14  ;;  %s25_s18 = sadd.s32 1, %s957_s15  ;;  %s961_s16 = sphi %s991_s16, %s13_s16   ;;  %s957_s15 = sphi %s989_s15, %s1330_s15   ;;  %s953_s14 = sphi %s987_s14, %s1329_s14   ;;  %s949_s13 = sphi %s985_s13, %s1328_s13   ;;  %s945_s12 = sphi %s983_s12, %s1327_s12  }
   0x4   : > { %p23_p0 = scmp.ge.s32.totalorder %s22_s17, 2  ;;  %p785_p1 = scmp.ge.s32.totalorder %s961_s16, 1 }
   0x5   : > { %p176_p2 = scmp.lt.s32.totalorder %s961_s16, 5 }
   0x6   : > { %s1332_s17 = smov (%p23_p0, %s22_s17), 0  ;;  %s1334_s18 = smov (!%p23_p0, %s25_s18), %s957_s15 }
   0x7   : > { %p177_p3 = pnand %p785_p1, %p176_p2  ;;  %p27_p4 = scmp.ge.s32.totalorder %s1334_s18, 2 }
   0x8   : > { %p216_p5 = scmp.lt.s32.totalorder (!%p177_p3), %s949_s13, 1  ;;  %p228_p6 = scmp.lt.s32.totalorder (!%p177_p3), %s945_s12, 1 }
   0x9   : > { %s1336_s18 = smov (%p27_p4, %s1334_s18), 0  ;;  %180 = sbr.rel (%p177_p3) target bundleno = 783 (0x30f), region = 32 }
   0xe   : > { %s1338_s13 = smov (!%p216_p5, %s949_s13), 1  ;;  %s1340_s12 = smov (!%p228_p6, %s945_s12), 1  ;;  %vm324_vm0 = vcmask 1041408   ;;  %vm275_vm1 = vcmask 31744  }
   0xf   : > { %s812_s19 = sshll.u32 %s1338_s13, 2  ;;  %s790_s20 = sshll.u32 %s1338_s13, 1 }
  0x10   : > { %s220_s23 = scalar_lea.vmem %s1323_s0, %s812_s19  ;;  %s1020_s24 = sadd.s32 %s790_s20, %s1340_s12 }
  0x11   : > { %v243_v0 = vld [vmem:[%s220_s23] sm:$0xf]  ;;  %s791_s25 = sshll.u32 %s1020_s24, 1  ;;  %s813_s29 = sshll.u32 %s1338_s13, 3 }
  0x12   : > { %246 = vst [vmem:[#allocation1] ss:$4 sm:$0xff] %v243_v0  ;;  %s233_s28 = scalar_lea.vmem %s1325_s2, %s791_s25  ;;  %s225_s5 = scalar_lea.vmem %s1324_s1, %s813_s29 }
  0x13   : > { %v244_v1 = vld [vmem:[%s233_s28] sm:$0x3]  ;;  %s793_s6 = sshll.u32 %s1020_s24, 3 }
  0x14   : > { %v326_v2 = vsel %vm324_vm0, %v244_v1, 0  ;;  %s241_s9 = scalar_lea.vmem %s1326_s3, %s793_s6 }
  0x15   : > { %335 = vmatpush.bf16.msra.mxu0 %v326_v2  ;;  %815 = vmatpush.bf16.msra.mxu3 %v326_v2 }
  0x16   : > { %814 = vmatpush.bf16.msra.mxu1 %v326_v2 }
  0x19   : > { %v247_v3 = vld.sshfl [vmem:[#allocation1] sm:$0xff pattern:$0x73625140]  ;;  %v248_v4 = vld.sshfl [vmem:[#allocation1 + $0x8] sm:$0xff pattern:$0x73625140] }
  0x1a   : > { %251 = vxpose.binary.xlu0.c.b16.start.end [1/2] (short) %v248_v4, %v247_v3, 128 }
  0xc6   : > { %v259_v5 = vpop.trf.xlu0 }
  0xc7   : > { %794 = vmatmul.msk.bf16.vlgmr.msra.gmra.mxu0 %vm275_vm1, %v259_v5 }
  0xce   : > { %v260_v6 = vpop.trf.xlu0 }
  0xd6   : > { %v261_v7 = vpop.trf.xlu0 }
  0xd7   : > { %795 = vmatmul.msk.bf16.gmra.mxu0 %vm275_vm1, %v261_v7 }
  0xde   : > { %v262_v8 = vpop.trf.xlu0 }
  0xe6   : > { %v263_v9 = vpop.trf.xlu0 }
  0xe7   : > { %796 = vmatmul.msk.bf16.gmra.mxu0 %vm275_vm1, %v263_v9 }
  0xee   : > { %v264_v10 = vpop.trf.xlu0 }
  0xf6   : > { %v265_v11 = vpop.trf.xlu0 }
  0xf7   : > { %797 = vmatmul.msk.bf16.gmra.mxu0 %vm275_vm1, %v265_v11 }
  0xfe   : > { %v266_v12 = vpop.trf.xlu0 }
  0xff   : > { %805 = vmatmul.msk.bf16.vlgmr.msra.gmra.mxu3 %vm275_vm1, %v266_v12 }
 0x106   : > { %v267_v13 = vpop.trf.xlu0 }
 0x107   : > { %798 = vmatmul.msk.bf16.gmra.mxu0 %vm275_vm1, %v267_v13 }
 0x10e   : > { %v268_v14 = vpop.trf.xlu0 }
 0x10f   : > { %806 = vmatmul.msk.bf16.gmra.mxu3 %vm275_vm1, %v268_v14 }
 0x116   : > { %v269_v15 = vpop.trf.xlu0 }
 0x117   : > { %799 = vmatmul.msk.bf16.gmra.mxu0 %vm275_vm1, %v269_v15 }
 0x11e   : > { %v270_v16 = vpop.trf.xlu0 }
 0x11f   : > { %807 = vmatmul.msk.bf16.gmra.mxu3 %vm275_vm1, %v270_v16 }
 0x126   : > { %v271_v17 = vpop.trf.xlu0 }
 0x127   : > { %800 = vmatmul.msk.bf16.vlgmr.msra.gmra.mxu1 %vm275_vm1, %v271_v17 }
 0x12e   : > { %v272_v18 = vpop.trf.xlu0 }
 0x12f   : > { %808 = vmatmul.msk.bf16.gmra.mxu3 %vm275_vm1, %v272_v18 }
 0x136   : > { %v273_v19 = vpop.trf.xlu0 }
 0x137   : > { %801 = vmatmul.msk.bf16.gmra.mxu1 %vm275_vm1, %v273_v19 }
 0x13e   : > { %v274_v20 = vpop.trf.xlu0 }
 0x13f   : > { %809 = vmatmul.msk.bf16.gmra.mxu3 %vm275_vm1, %v274_v20 }
 0x144   : > { %v1042_v21 = vpop.f32.mrf.mxu0 }
 0x147   : > { %802 = vmatmul.msk.bf16.gmra.mxu1 %vm275_vm1, %v260_v6 }
 0x14c   : > { %v1044_v22 = vpop.f32.mrf.mxu0 }
 0x154   : > { %v1046_v23 = vpop.f32.mrf.mxu0 }
 0x157   : > { %803 = vmatmul.msk.bf16.gmra.mxu1 %vm275_vm1, %v262_v8 }
 0x15c   : > { %v1048_v24 = vpop.f32.mrf.mxu0 }
 0x164   : > { %v1052_v26 = vpop.f32.mrf.mxu0 }
 0x165   : > { %v417_v52 = vmax.f32 %v1042_v21, %v1052_v26 }
 0x167   : > { %804 = vmatmul.msk.bf16.gmra.mxu1 %vm275_vm1, %v264_v10 }
 0x16c   : > { %v1056_v28 = vpop.f32.mrf.mxu0 }
 0x16d   : > { %v418_v60 = vmax.f32 %v1044_v22, %v1056_v28 }
 0x174   : > { %v1062_v31 = vpop.f32.mrf.mxu0 }
 0x175   : > { %v419_v50 = vmax.f32 %v1046_v23, %v1062_v31 }
 0x17c   : > { %v1068_v34 = vpop.f32.mrf.mxu0 }
 0x17d   : > { %v420_v49 = vmax.f32 %v1048_v24, %v1068_v34 }
 0x182   : > { %v1050_v25 = vpop.f32.mrf.mxu3 }
 0x184   : > { %v1076_v38 = vpop.f32.mrf.mxu0 }
 0x185   : > { %v421_v56 = vmax.f32 %v417_v52, %v1076_v38 }
 0x18a   : > { %v1054_v27 = vpop.f32.mrf.mxu3 }
 0x18c   : > { %v1082_v41 = vpop.f32.mrf.mxu0 }
 0x18d   : > { %v422_v63 = vmax.f32 %v418_v60, %v1082_v41 }
 0x192   : > { %v1060_v30 = vpop.f32.mrf.mxu3 }
 0x194   : > { %v1088_v44 = vpop.f32.mrf.mxu0 }
 0x195   : > { %v423_v53 = vmax.f32 %v419_v50, %v1088_v44 }
 0x19a   : > { %v1066_v33 = vpop.f32.mrf.mxu3 }
 0x19c   : > { %v1094_v47 = vpop.f32.mrf.mxu0 }
 0x19d   : > { %v424_v51 = vmax.f32 %v420_v49, %v1094_v47 }
 0x1a2   : > { %v1072_v36 = vpop.f32.mrf.mxu3 }
 0x1a4   : > { %v1058_v29 = vpop.f32.mrf.mxu1 }
 0x1a5   : > { %v425_v61 = vmax.f32 %v421_v56, %v1058_v29 }
 0x1aa   : > { %v1080_v40 = vpop.f32.mrf.mxu3 }
 0x1ac   : > { %v1064_v32 = vpop.f32.mrf.mxu1 }
 0x1ad   : > { %v426_v2 = vmax.f32 %v422_v63, %v1064_v32 }
 0x1b2   : > { %v1086_v43 = vpop.f32.mrf.mxu3 }
 0x1b4   : > { %v1070_v35 = vpop.f32.mrf.mxu1 }
 0x1b5   : > { %v427_v57 = vmax.f32 %v423_v53, %v1070_v35 }
 0x1ba   : > { %v1092_v46 = vpop.f32.mrf.mxu3 }
 0x1bc   : > { %v1074_v37 = vpop.f32.mrf.mxu1 }
 0x1bd   : > { %v428_v54 = vmax.f32 %v424_v51, %v1074_v37 }
 0x1c2   : > { %v1107_v55 = vpop.f32.mrf.mxu3 }
 0x1c4   : > { %v1078_v39 = vpop.f32.mrf.mxu1 }
 0x1c5   : > { %v429_v0 = vmax.f32 %v425_v61, %v1078_v39 }
 0x1ca   : > { %v1126_v7 = vpop.f32.mrf.mxu3 }
 0x1cc   : > { %v1084_v42 = vpop.f32.mrf.mxu1 }
 0x1cd   : > { %v430_v5 = vmax.f32 %v426_v2, %v1084_v42 }
 0x1d4   : > { %v1090_v45 = vpop.f32.mrf.mxu1 }
 0x1d5   : > { %v431_v62 = vmax.f32 %v427_v57, %v1090_v45 }
 0x1d7   : > { %v435_v3 = vmax.f32 %v431_v62, %v1050_v25 }
 0x1d9   : > { %v439_v9 = vmax.f32 %v435_v3, %v1072_v36 }
 0x1db   : > { %v443_v14 = vmax.f32 %v439_v9, %v1107_v55 }
 0x1dc   : > { %v1096_v48 = vpop.f32.mrf.mxu1 }
 0x1dd   : > { %v432_v58 = vmax.f32 %v428_v54, %v1096_v48 }
 0x1df   : > { %v436_v1 = vmax.f32 %v432_v58, %v1054_v27 }
 0x1e1   : > { %v440_v6 = vmax.f32 %v436_v1, %v1080_v40 }
 0x1e3   : > { %v444_v12 = vmax.f32 %v440_v6, %v1126_v7 }
 0x1e4   : > { %v1112_v59 = vpop.f32.mrf.mxu1 }
 0x1e5   : > { %v433_v4 = vmax.f32 %v429_v0, %v1112_v59  ;;  %v446_v17 = vmax.f32 %v443_v14, %v444_v12 }
 0x1e7   : > { %v437_v10 = vmax.f32 %v433_v4, %v1060_v30 }
 0x1e9   : > { %v441_v15 = vmax.f32 %v437_v10, %v1086_v43 }
 0x1ec   : > { %v1128_v8 = vpop.f32.mrf.mxu1 }
 0x1ed   : > { %v434_v11 = vmax.f32 %v430_v5, %v1128_v8 }
 0x1ef   : > { %v438_v13 = vmax.f32 %v434_v11, %v1066_v33 }
 0x1f1   : > { %v442_v16 = vmax.f32 %v438_v13, %v1092_v46 }
 0x1f3   : > { %v445_v18 = vmax.f32 %v441_v15, %v442_v16 }
 0x1f5   : > { %v447_v19 = vmax.f32 %v445_v18, %v446_v17 }
 0x1f7   : > { %v448_v20 = vrot.slane %v447_v19, 4 }
 0x1f9   : > { %v449_v49 = vmax.f32 %v447_v19, %v448_v20 }
 0x1fb   : > { %v450_v50 = vrot.slane %v449_v49, 2 }
 0x1fd   : > { %v451_v51 = vmax.f32 %v449_v49, %v450_v50 }
 0x1ff   : > { %v452_v52 = vrot.slane %v451_v51, 1 }
 0x201   : > { %v1138_v53 = vmax.f32 %v451_v51, %v452_v52 }
 0x203   : > { %v454_v54 = vsub.f32 %v1042_v21, %v1138_v53  ;;  %v455_v56 = vsub.f32 %v1044_v22, %v1138_v53  ;;  %v456_v57 = vsub.f32 %v1046_v23, %v1138_v53  ;;  %v457_v58 = vsub.f32 %v1048_v24, %v1138_v53 }
 0x204   : > { %v458_v62 = vsub.f32 %v1052_v26, %v1138_v53  ;;  %v459_v0 = vsub.f32 %v1056_v28, %v1138_v53  ;;  %v460_v22 = vsub.f32 %v1062_v31, %v1138_v53  ;;  %v461_v24 = vsub.f32 %v1068_v34, %v1138_v53 }
 0x205   : > { %v486_v60 = vmul.f32 1.442695, %v454_v54  ;;  %v488_v61 = vmul.f32 1.442695, %v455_v56  ;;  %v490_v63 = vmul.f32 1.442695, %v456_v57  ;;  %v462_v3 = vsub.f32 %v1076_v38, %v1138_v53 }
 0x206   : > { %v492_v21 = vmul.f32 1.442695, %v457_v58  ;;  %v494_v23 = vmul.f32 1.442695, %v458_v62  ;;  %v496_v1 = vmul.f32 1.442695, %v459_v0  ;;  %v463_v5 = vsub.f32 %v1082_v41, %v1138_v53 }
 0x207   : > { %857 = vpow2.f32 %v486_v60  ;;  %v498_v28 = vmul.f32 1.442695, %v460_v22  ;;  %v500_v34 = vmul.f32 1.442695, %v461_v24  ;;  %v464_v10 = vsub.f32 %v1088_v44, %v1138_v53 }
 0x208   : > { %859 = vpow2.f32 %v488_v61  ;;  %v502_v38 = vmul.f32 1.442695, %v462_v3  ;;  %v465_v13 = vsub.f32 %v1094_v47, %v1138_v53  ;;  %v504_v41 = vmul.f32 1.442695, %v463_v5 }
 0x209   : > { %861 = vpow2.f32 %v490_v63  ;;  %v466_v16 = vsub.f32 %v1058_v29, %v1138_v53  ;;  %v506_v44 = vmul.f32 1.442695, %v464_v10  ;;  %v467_v19 = vsub.f32 %v1064_v32, %v1138_v53 }
 0x20a   : > { %863 = vpow2.f32 %v492_v21  ;;  %v508_v47 = vmul.f32 1.442695, %v465_v13  ;;  %v468_v50 = vsub.f32 %v1070_v35, %v1138_v53  ;;  %v469_v54 = vsub.f32 %v1074_v37, %v1138_v53 }
 0x20b   : > { %865 = vpow2.f32 %v494_v23  ;;  %v510_v29 = vmul.f32 1.442695, %v466_v16  ;;  %v512_v32 = vmul.f32 1.442695, %v467_v19  ;;  %v470_v58 = vsub.f32 %v1078_v39, %v1138_v53 }
 0x20c   : > { %867 = vpow2.f32 %v496_v1  ;;  %v514_v35 = vmul.f32 1.442695, %v468_v50  ;;  %v471_v62 = vsub.f32 %v1084_v42, %v1138_v53  ;;  %v516_v37 = vmul.f32 1.442695, %v469_v54 }
 0x20d   : > { %v1156_v2 = vpop.eup %857  ;;  %869 = vpow2.f32 %v498_v28  ;;  %v472_v21 = vsub.f32 %v1090_v45, %v1138_v53  ;;  %v518_v39 = vmul.f32 1.442695, %v470_v58  ;;  %v473_v24 = vsub.f32 %v1096_v48, %v1138_v53 }
 0x20e   : > { %v1158_v26 = vpop.eup %859  ;;  %871 = vpow2.f32 %v500_v34  ;;  %v520_v42 = vmul.f32 1.442695, %v471_v62  ;;  %v474_v28 = vsub.f32 %v1112_v59, %v1138_v53  ;;  %v475_v34 = vsub.f32 %v1128_v8, %v1138_v53 }
 0x20f   : > { %v550_v4 = vadd.f32 %v1158_v26, %v1156_v2  ;;  %v1164_v31 = vpop.eup %861  ;;  %873 = vpow2.f32 %v502_v38  ;;  %v522_v45 = vmul.f32 1.442695, %v472_v21  ;;  %v524_v48 = vmul.f32 1.442695, %v473_v24 }
 0x210   : > { %v1169_v9 = vpop.eup %863  ;;  %875 = vpow2.f32 %v504_v41  ;;  %v476_v38 = vsub.f32 %v1050_v25, %v1138_v53  ;;  %v526_v59 = vmul.f32 1.442695, %v474_v28  ;;  %v477_v41 = vsub.f32 %v1054_v27, %v1138_v53 }
 0x211   : > { %v551_v6 = vadd.f32 %v1164_v31, %v550_v4  ;;  %v1174_v12 = vpop.eup %865  ;;  %877 = vpow2.f32 %v506_v44  ;;  %v528_v8 = vmul.f32 1.442695, %v475_v34  ;;  %v478_v44 = vsub.f32 %v1060_v30, %v1138_v53 }
 0x212   : > { %v1179_v15 = vpop.eup %867  ;;  %879 = vpow2.f32 %v508_v47  ;;  %v530_v25 = vmul.f32 1.442695, %v476_v38  ;;  %v479_v47 = vsub.f32 %v1066_v33, %v1138_v53  ;;  %v532_v27 = vmul.f32 1.442695, %v477_v41 }
 0x213   : > { %v552_v11 = vadd.f32 %v1169_v9, %v551_v6  ;;  %v1184_v18 = vpop.eup %869  ;;  %881 = vpow2.f32 %v510_v29  ;;  %v480_v29 = vsub.f32 %v1072_v36, %v1138_v53  ;;  %v534_v30 = vmul.f32 1.442695, %v478_v44 }
 0x214   : > { %v1189_v49 = vpop.eup %871  ;;  %883 = vpow2.f32 %v512_v32  ;;  %v481_v32 = vsub.f32 %v1080_v40, %v1138_v53  ;;  %v536_v33 = vmul.f32 1.442695, %v479_v47 }
 0x215   : > { %v553_v14 = vadd.f32 %v1174_v12, %v552_v11  ;;  %v1194_v52 = vpop.eup %873  ;;  %885 = vpow2.f32 %v514_v35  ;;  %v482_v35 = vsub.f32 %v1086_v43, %v1138_v53  ;;  %v538_v36 = vmul.f32 1.442695, %v480_v29 }
 0x216   : > { %v1199_v57 = vpop.eup %875  ;;  %887 = vpow2.f32 %v516_v37  ;;  %v483_v37 = vsub.f32 %v1092_v46, %v1138_v53  ;;  %v540_v40 = vmul.f32 1.442695, %v481_v32 }
 0x217   : > { %v554_v17 = vadd.f32 %v1179_v15, %v553_v14  ;;  %v1204_v61 = vpop.eup %877  ;;  %889 = vpow2.f32 %v518_v39  ;;  %v484_v39 = vsub.f32 %v1107_v55, %v1138_v53  ;;  %v542_v43 = vmul.f32 1.442695, %v482_v35 }
 0x218   : > { %v1209_v0 = vpop.eup %879  ;;  %891 = vpow2.f32 %v520_v42  ;;  %v485_v42 = vsub.f32 %v1126_v7, %v1138_v53 }
 0x219   : > { %v555_v20 = vadd.f32 %v1184_v18, %v554_v17  ;;  %v1214_v23 = vpop.eup %881  ;;  %893 = vpow2.f32 %v522_v45  ;;  %v546_v45 = vmul.f32 1.442695, %v484_v39 }
 0x21a   : > { %v1219_v3 = vpop.eup %883  ;;  %895 = vpow2.f32 %v524_v48  ;;  %v548_v48 = vmul.f32 1.442695, %v485_v42 }
 0x21b   : > { %v556_v51 = vadd.f32 %v1189_v49, %v555_v20  ;;  %v1224_v5 = vpop.eup %885  ;;  %897 = vpow2.f32 %v526_v59 }
 0x21c   : > { %v1229_v10 = vpop.eup %887  ;;  %899 = vpow2.f32 %v528_v8 }
 0x21d   : > { %v557_v56 = vadd.f32 %v1194_v52, %v556_v51  ;;  %v1234_v13 = vpop.eup %889  ;;  %901 = vpow2.f32 %v530_v25 }
 0x21e   : > { %v1239_v16 = vpop.eup %891  ;;  %903 = vpow2.f32 %v532_v27 }
 0x21f   : > { %v558_v60 = vadd.f32 %v1199_v57, %v557_v56  ;;  %v1244_v19 = vpop.eup %893  ;;  %905 = vpow2.f32 %v534_v30 }
 0x220   : > { %v1249_v50 = vpop.eup %895  ;;  %907 = vpow2.f32 %v536_v33 }
 0x221   : > { %v559_v63 = vadd.f32 %v1204_v61, %v558_v60  ;;  %v1254_v54 = vpop.eup %897  ;;  %909 = vpow2.f32 %v538_v36 }
 0x222   : > { %v1259_v58 = vpop.eup %899  ;;  %911 = vpow2.f32 %v540_v40 }
 0x223   : > { %v560_v22 = vadd.f32 %v1209_v0, %v559_v63  ;;  %v1264_v62 = vpop.eup %901  ;;  %913 = vpow2.f32 %v542_v43 }
 0x224   : > { %v1269_v21 = vpop.eup %903 }
 0x225   : > { %v561_v1 = vadd.f32 %v1214_v23, %v560_v22  ;;  %v906_v24 = vpop.eup %905 }
 0x226   : > { %v908_v28 = vpop.eup %907 }
 0x227   : > { %v562_v4 = vadd.f32 %v1219_v3, %v561_v1  ;;  %v544_v1 = vmul.f32 1.442695, %v483_v37  ;;  %v910_v34 = vpop.eup %909 }
 0x228   : > { %v912_v55 = vpop.eup %911 }
 0x229   : > { %v563_v6 = vadd.f32 %v1224_v5, %v562_v4  ;;  %915 = vpow2.f32 %v544_v1  ;;  %v914_v59 = vpop.eup %913 }
 0x22a   : > { %917 = vpow2.f32 %v546_v45 }
 0x22b   : > { %v564_v11 = vadd.f32 %v1229_v10, %v563_v6  ;;  %919 = vpow2.f32 %v548_v48 }
 0x22d   : > { %v565_v14 = vadd.f32 %v1234_v13, %v564_v11 }
 0x22f   : > { %v566_v17 = vadd.f32 %v1239_v16, %v565_v14  ;;  %v916_v41 = vpop.eup %915 }
 0x230   : > { %v918_v7 = vpop.eup %917 }
 0x231   : > { %v567_v20 = vadd.f32 %v1244_v19, %v566_v17  ;;  %v920_v14 = vpop.eup %919 }
 0x233   : > { %v568_v51 = vadd.f32 %v1249_v50, %v567_v20 }
 0x235   : > { %v569_v56 = vadd.f32 %v1254_v54, %v568_v51 }
 0x237   : > { %v570_v60 = vadd.f32 %v1259_v58, %v569_v56 }
 0x239   : > { %v571_v63 = vadd.f32 %v1264_v62, %v570_v60 }
 0x23b   : > { %v572_v22 = vadd.f32 %v1269_v21, %v571_v63 }
 0x23d   : > { %v573_v46 = vadd.f32 %v906_v24, %v572_v22 }
 0x23f   : > { %v574_v4 = vadd.f32 %v908_v28, %v573_v46 }
 0x241   : > { %v575_v6 = vadd.f32 %v910_v34, %v574_v4 }
 0x243   : > { %v576_v38 = vadd.f32 %v912_v55, %v575_v6 }
 0x245   : > { %v577_v11 = vadd.f32 %v914_v59, %v576_v38 }
 0x247   : > { %v578_v8 = vadd.f32 %v916_v41, %v577_v11 }
 0x249   : > { %v579_v53 = vadd.f32 %v918_v7, %v578_v8 }
 0x24b   : > { %v580_v44 = vadd.f32 %v920_v14, %v579_v53 }
 0x24d   : > { %v581_v25 = vrot.slane %v580_v44, 4 }
 0x24f   : > { %v582_v17 = vadd.f32 %v581_v25, %v580_v44 }
 0x251   : > { %v583_v47 = vrot.slane %v582_v17, 2 }
 0x253   : > { %v584_v27 = vadd.f32 %v583_v47, %v582_v17 }
 0x255   : > { %v585_v20 = vrot.slane %v584_v27, 1 }
 0x257   : > { %v586_v29 = vadd.f32 %v585_v20, %v584_v27 }
 0x259   : > { %921 = vrcp.f32 %v586_v29 }
 0x25f   : > { %v922_v30 = vpop.eup %921 }
 0x260   : > { %v602_v51 = vmul.f32 %v922_v30, %v1224_v5  ;;  %v603_v32 = vmul.f32 %v922_v30, %v1229_v10  ;;  %v618_v33 = vmul.f32 %v922_v30, %v918_v7  ;;  %v619_v56 = vmul.f32 %v922_v30, %v920_v14 }
 0x261   : > { %v600_v35 = vmul.f32 %v922_v30, %v1214_v23  ;;  %v601_v36 = vmul.f32 %v922_v30, %v1219_v3  ;;  %v616_v60 = vmul.f32 %v922_v30, %v914_v59  ;;  %v617_v37 = vmul.f32 %v922_v30, %v916_v41 }
 0x262   : > { %v628_v40 = vpack.c.bf16 %v603_v32, %v602_v51  ;;  %v636_v63 = vpack.c.bf16 %v619_v56, %v618_v33  ;;  %v598_v39 = vmul.f32 %v922_v30, %v1204_v61  ;;  %v599_v43 = vmul.f32 %v922_v30, %v1209_v0 }
 0x263   : > { %v627_v22 = vpack.c.bf16 %v601_v36, %v600_v35  ;;  %v614_v42 = vmul.f32 %v922_v30, %v910_v34  ;;  %v615_v10 = vmul.f32 %v922_v30, %v912_v55  ;;  %v635_v1 = vpack.c.bf16 %v617_v37, %v616_v60 }
 0x264   : > { %644 = vmatpush.bf16.msrb.mxu1 %v628_v40  ;;  %657 = vmatpush.bf16.msra.mxu2 %v636_v63  ;;  %v626_v5 = vpack.c.bf16 %v599_v43, %v598_v39  ;;  %v608_v46 = vmul.f32 %v922_v30, %v1254_v54  ;;  %v609_v23 = vmul.f32 %v922_v30, %v1259_v58 }
 0x265   : > { %v634_v3 = vpack.c.bf16 %v615_v10, %v614_v42  ;;  %v596_v45 = vmul.f32 %v922_v30, %v1194_v52  ;;  %v597_v61 = vmul.f32 %v922_v30, %v1199_v57  ;;  %v606_v0 = vmul.f32 %v922_v30, %v1244_v19 }
 0x266   : > { %v612_v4 = vmul.f32 %v922_v30, %v906_v24  ;;  %v613_v48 = vmul.f32 %v922_v30, %v908_v28  ;;  %v631_v6 = vpack.c.bf16 %v609_v23, %v608_v46  ;;  %v607_v34 = vmul.f32 %v922_v30, %v1249_v50 }
 0x267   : > { %v604_v55 = vmul.f32 %v922_v30, %v1234_v13  ;;  %v605_v54 = vmul.f32 %v922_v30, %v1239_v16  ;;  %v625_v38 = vpack.c.bf16 %v597_v61, %v596_v45  ;;  %v594_v52 = vmul.f32 %v922_v30, %v1184_v18 }
 0x268   : > { %645 = vmatpush.bf16.msrb.mxu1 %v627_v22  ;;  %658 = vmatpush.bf16.msra.mxu2 %v635_v1  ;;  %v630_v58 = vpack.c.bf16 %v607_v34, %v606_v0  ;;  %v633_v57 = vpack.c.bf16 %v613_v48, %v612_v4  ;;  %v595_v19 = vmul.f32 %v922_v30, %v1189_v49 }
 0x269   : > { %v629_v59 = vpack.c.bf16 %v605_v54, %v604_v55  ;;  %v610_v24 = vmul.f32 %v922_v30, %v1264_v62  ;;  %v611_v28 = vmul.f32 %v922_v30, %v1269_v21  ;;  %v592_v16 = vmul.f32 %v922_v30, %v1174_v12  ;;  %v620_v21 = vld [vmem:[%s225_s5] sm:$0xff] }
 0x26a   : > { %v624_v13 = vpack.c.bf16 %v595_v19, %v594_v52  ;;  %v593_v11 = vmul.f32 %v922_v30, %v1179_v15  ;;  %v590_v49 = vmul.f32 %v922_v30, %v1164_v31  ;;  %v591_v62 = vmul.f32 %v922_v30, %v1169_v9 }
 0x26b   : > { %v632_v50 = vpack.c.bf16 %v611_v28, %v610_v24  ;;  %v588_v12 = vmul.f32 %v922_v30, %v1156_v2  ;;  %v589_v15 = vmul.f32 %v922_v30, %v1158_v26  ;;  %v638_v8 = vunpack.c.l.b16 %v620_v21 }
 0x26c   : > { %646 = vmatpush.bf16.msrb.mxu1 %v626_v5  ;;  %659 = vmatpush.bf16.msra.mxu2 %v634_v3  ;;  %v623_v18 = vpack.c.bf16 %v593_v11, %v592_v16  ;;  %v622_v41 = vpack.c.bf16 %v591_v62, %v590_v49  ;;  %v639_v7 = vunpack.c.h.b16 %v620_v21 }
 0x26d   : > { %v621_v53 = vpack.c.bf16 %v589_v15, %v588_v12  ;;  %v640_v44 = vpack.c.b16 %v638_v8, %v638_v8 }
 0x26e   : > { %v641_v14 = vpack.c.b16 %v639_v7, %v639_v7 }
 0x270   : > { %647 = vmatpush.bf16.msrb.mxu1 %v625_v38  ;;  %660 = vmatpush.bf16.msra.mxu2 %v633_v57 }
 0x274   : > { %648 = vmatpush.bf16.msrb.mxu1 %v624_v13  ;;  %661 = vmatpush.bf16.msra.mxu2 %v632_v50 }
 0x278   : > { %649 = vmatpush.bf16.msrb.mxu1 %v623_v18  ;;  %662 = vmatpush.bf16.msra.mxu2 %v631_v6 }
 0x27c   : > { %650 = vmatpush.bf16.msrb.mxu1 %v622_v41  ;;  %663 = vmatpush.bf16.msra.mxu2 %v630_v58 }
 0x280   : > { %651 = vmatpush.bf16.msrb.mxu1 %v621_v53  ;;  %664 = vmatpush.bf16.msra.mxu2 %v629_v59 }
 0x283   : > { %665 = vmatmul.bf16.vlgmr.msra.gmra.mxu2 %v641_v14  ;;  %652 = vmatmul.bf16.vlgmr.msrb.gmra.mxu1 %v640_v44 }
 0x300   : > { %v653_v31 = vpop.f32.mrf.mxu1 }
 0x306   : > { %v666_v2 = vpop.f32.mrf.mxu2 }
 0x307   : > { %v667_v9 = vadd.f32 %v666_v2, %v653_v31 }
 0x308   : > { %v655_v26 = vpop.f32.mrf.mxu1 }
 0x309   : > { %670 = vst [vmem:[%s241_s9] sm:$0xff] %v667_v9 }
 0x30e   : > { %v668_v25 = vpop.f32.mrf.mxu2 }
 0x30f PF: > { %s13_s16 = sadd.s32 1, %s961_s16   ;;  %s1327_s12 = smov %s953_s14 }
 0x310   : > { %p10_p7 = scmp.ge.s32.totalorder %s13_s16, 6   ;;  %s1328_s13 = smov %s957_s15 }
 0x311   : > { %s1329_s14 = smov %s1332_s17  ;;  %s1330_s15 = smov %s1336_s18 }
 0x312   :  { %12 = sbr.rel (!%p10_p7) target bundleno = 3 (0x3), region = 68 }

</bundles_post_ra>
